<compile_context>
chip_gen: v7x
topology: tpu7x:2x2x1
jax: 0.10.0
libtpu: 0.0.40
codegen_flags: <defaults>
</compile_context>

<pallas_src>
import functools

import numpy as np
import jax
import jax.numpy as jnp
from jax import lax
from jax.experimental import pallas as pl
from jax.experimental.pallas import tpu as pltpu

LANE = 128


def _round_up(x, m):
    return ((x + m - 1) // m) * m


# ------------------------------- fused kernel -------------------------------- #

def _mbottleneck_kernel(xw_ref, w1_ref, s1_ref, b1_ref, w2_ref, s2_ref, b2_ref,
                        w3_ref, s3_ref, b3_ref, o_ref, *, H, W):
    """One (batch, row-tile) grid step of the fused bottleneck forward.

    xw_ref : (TH+2, Wp, Cin_p)  bf16  haloed input rows (halo rows/cols/channels are 0)
    w1_ref : (Cin_p, Cmid)      bf16
    w2_ref : (3, 3*Cmid, Cmid)  bf16  [kh, kw taps stacked on K, cout]
    w3_ref : (Cmid, Cout_p)     bf16
    s*/b*  : (1, C)             f32   folded BN scale / shift
    o_ref  : (TH, W, Cout_p)    f32   output row tile
    """
    THp2, Wp, Cin = xw_ref.shape
    TH, _, Cout = o_ref.shape
    Cmid = w1_ref.shape[1]

    # ---- stage 1: relu -> conv1(1x1) -> bn1 -> relu  (tile + 2 halo rows) ----
    xr = jnp.maximum(xw_ref[...], 0)                            # relu(x), exact in bf16
    h1 = jnp.dot(xr.reshape(THp2 * Wp, Cin), w1_ref[...],
                 preferred_element_type=jnp.float32)            # MXU, f32 accumulation
    h1 = jnp.maximum(h1 * s1_ref[...] + b1_ref[...], 0.0)       # bn1 + relu in f32
    h1 = h1.reshape(THp2, Wp, Cmid)

    # conv2's zero padding: halo rows (outside the image) and halo columns must be
    # exactly zero entering the 3x3 conv.
    row = (lax.broadcasted_iota(jnp.int32, (THp2, Wp, 1), 0)
           + pl.program_id(1) * TH - 1)                         # global image row
    col = lax.broadcasted_iota(jnp.int32, (THp2, Wp, 1), 1)
    valid = (row >= 0) & (row < H) & (col >= 1) & (col <= W)
    y1 = jnp.where(valid, h1, 0.0).astype(jnp.bfloat16)         # (TH+2, Wp, Cmid)

    # ---- stage 2: conv2(3x3, pad=1) -> bn2 -> relu -> conv3(1x1) -> bn3 ----
    # im2col along width, hoisted out of the kh loop (built once per tile).
    taps = jnp.concatenate(
        [y1[:, 0:W, :], y1[:, 1:W + 1, :], y1[:, 2:W + 2, :]],
        axis=-1)                                                # (TH+2, W, 3*Cmid)

    acc = jnp.zeros((TH * W, Cmid), jnp.float32)
    for dh in range(3):                                         # 3 deep matmuls, K=3*Cmid
        acc = acc + jnp.dot(taps[dh:dh + TH].reshape(TH * W, 3 * Cmid), w2_ref[dh],
                            preferred_element_type=jnp.float32)

    h2 = jnp.maximum(acc * s2_ref[...] + b2_ref[...], 0.0)      # bn2 + relu in f32
    h3 = jnp.dot(h2.astype(jnp.bfloat16), w3_ref[...],
                 preferred_element_type=jnp.float32)            # conv3 (1x1)
    h3 = h3 * s3_ref[...] + b3_ref[...]                         # bn3 in f32
    o_ref[...] = h3.reshape(TH, W, Cout).astype(o_ref.dtype)    # lane-dense full store


# --------------------------------- wrapper ------------------------------------ #

def mbottleneck_forward(x_nchw, p, *, tile_h=8):
    """x_nchw: (N, Cin, H, W) float32. Returns (N, 4*planes, H, W) float32."""
    N, Cin, H, W = x_nchw.shape
    width = p["w1"].shape[1]
    Cout = p["w3"].shape[1]
    Cin_p = _round_up(Cin, LANE)
    Cmid = _round_up(width, LANE)
    Cout_p = _round_up(Cout, LANE)
    Wp = _round_up(W + 2, 8)                 # width incl. 3x3 halo, sublane-aligned

    tile_h = min(tile_h, H)
    assert H % tile_h == 0, "TODO(synk): ragged spatial tiling not implemented"
    n_t = H // tile_h
    bf16 = jnp.bfloat16

    def pad_axis(a, axis, new):
        pad = [(0, 0)] * a.ndim
        pad[axis] = (0, new - a.shape[axis])
        return jnp.pad(a, pad)

    # NCHW -> NHWC, zero-pad the 3x3 halo (1 row top/bottom, 1 col left, right edge up
    # to a sublane multiple) and channels to 128 lanes, cast to bf16; then materialize
    # per-tile overlapping row windows so plain Blocked BlockSpecs keep the automatic
    # double-buffered pipeline with both grid axes parallel.
    x = jnp.transpose(x_nchw, (0, 2, 3, 1))
    x = jnp.pad(x, ((0, 0), (1, 1), (1, Wp - W - 1), (0, Cin_p - Cin))).astype(bf16)
    xw = jnp.stack([x[:, t * tile_h: t * tile_h + tile_h + 2]
                    for t in range(n_t)], axis=1)   # (N, n_t, tile_h+2, Wp, Cin_p)

    w1 = pad_axis(pad_axis(p["w1"], 0, Cin_p), 1, Cmid).astype(bf16)
    w2 = pad_axis(pad_axis(p["w2"], 2, Cmid), 3, Cmid)          # (3, 3, Cmid, Cmid)
    w2 = w2.reshape(3, 3 * Cmid, Cmid).astype(bf16)             # kw taps stacked on K
    w3 = pad_axis(pad_axis(p["w3"], 0, Cmid), 1, Cout_p).astype(bf16)
    s1 = pad_axis(p["s1"], 1, Cmid)
    b1 = pad_axis(p["b1"], 1, Cmid)
    s2 = pad_axis(p["s2"], 1, Cmid)
    b2 = pad_axis(p["b2"], 1, Cmid)
    s3 = pad_axis(p["s3"], 1, Cout_p)
    b3 = pad_axis(p["b3"], 1, Cout_p)

    kernel = functools.partial(_mbottleneck_kernel, H=H, W=W)

    out_p = pl.pallas_call(
        kernel,
        out_shape=jax.ShapeDtypeStruct((N, H, W, Cout_p), jnp.float32),
        grid=(N, n_t),
        in_specs=[
            pl.BlockSpec((None, None, tile_h + 2, Wp, Cin_p),
                         lambda n, t: (n, t, 0, 0, 0)),
            pl.BlockSpec((Cin_p, Cmid), lambda n, t: (0, 0)),
            pl.BlockSpec((1, Cmid), lambda n, t: (0, 0)),
            pl.BlockSpec((1, Cmid), lambda n, t: (0, 0)),
            pl.BlockSpec((3, 3 * Cmid, Cmid), lambda n, t: (0, 0, 0)),
            pl.BlockSpec((1, Cmid), lambda n, t: (0, 0)),
            pl.BlockSpec((1, Cmid), lambda n, t: (0, 0)),
            pl.BlockSpec((Cmid, Cout_p), lambda n, t: (0, 0)),
            pl.BlockSpec((1, Cout_p), lambda n, t: (0, 0)),
            pl.BlockSpec((1, Cout_p), lambda n, t: (0, 0)),
        ],
        out_specs=pl.BlockSpec((None, tile_h, W, Cout_p), lambda n, t: (n, t, 0, 0)),
        compiler_params=pltpu.CompilerParams(
            dimension_semantics=("parallel", "parallel"),
            vmem_limit_bytes=32 * 1024 * 1024),
    )(xw, w1, s1, b1, w2, s2, b2, w3, s3, b3)

    # TODO(synk): a fused consumer should take NHWC directly; the channel-unpad +
    # NCHW transpose below is an extra HBM pass kept only for the module interface.
    out = out_p[..., :Cout]
    return jnp.transpose(out, (0, 3, 1, 2))


# ------------------------- parameters & reference ----------------------------- #

def make_params(key, inplanes, planes, base_width=64, groups=1, eps=1e-5):
    width = int(planes * (base_width / 64.0)) * groups
    cout = planes * 4  # expansion = 4
    ks = jax.random.split(key, 15)

    def bn(kg, kb, km, kv, c):
        gamma = jax.random.uniform(kg, (c,), jnp.float32, 0.5, 1.5)
        beta = 0.1 * jax.random.normal(kb, (c,), jnp.float32)
        mean = 0.1 * jax.random.normal(km, (c,), jnp.float32)
        var = jax.random.uniform(kv, (c,), jnp.float32, 0.5, 1.5)
        scale = gamma / jnp.sqrt(var + eps)
        shift = beta - mean * scale
        return scale.reshape(1, c), shift.reshape(1, c)

    # conv weights stored in matmul layout: (in, out) and (kh, kw, in, out)
    w1 = 0.1 * jax.random.normal(ks[0], (inplanes, width), jnp.float32)
    w2 = 0.1 * jax.random.normal(ks[1], (3, 3, width, width), jnp.float32)
    w3 = 0.1 * jax.random.normal(ks[2], (width, cout), jnp.float32)
    s1, b1 = bn(ks[3], ks[4], ks[5], ks[6], width)
    s2, b2 = bn(ks[7], ks[8], ks[9], ks[10], width)
    s3, b3 = bn(ks[11], ks[12], ks[13], ks[14], cout)
    return dict(w1=w1, s1=s1, b1=b1, w2=w2, s2=s2, b2=b2, w3=w3, s3=s3, b3=b3)


def reference_forward(x_nchw, p):
    """Pure-JAX reference with the same numerics as the kernel:
    bf16 weights/activations feeding the matmuls, f32 accumulation, f32 BN/ReLU."""
    f32 = jnp.float32

    def bf(a):  # round through bf16 (what the kernel feeds the MXU)
        return a.astype(jnp.bfloat16).astype(f32)

    dn = ("NHWC", "HWIO", "NHWC")
    hp = jax.lax.Precision.HIGHEST
    x = jnp.transpose(x_nchw, (0, 2, 3, 1))
    h = jax.nn.relu(bf(x))
    h = lax.conv_general_dilated(h, bf(p["w1"][None, None]), (1, 1), "VALID",
                                 dimension_numbers=dn, precision=hp)
    h = jax.nn.relu(h * p["s1"] + p["b1"])
    h = lax.conv_general_dilated(bf(h), bf(p["w2"]), (1, 1), ((1, 1), (1, 1)),
                                 dimension_numbers=dn, precision=hp)
    h = jax.nn.relu(h * p["s2"] + p["b2"])
    h = lax.conv_general_dilated(bf(h), bf(p["w3"][None, None]), (1, 1), "VALID",
                                 dimension_numbers=dn, precision=hp)
    h = h * p["s3"] + p["b3"]
    return jnp.transpose(h, (0, 3, 1, 2))


# ------------------------------------ main ------------------------------------ #

if __name__ == "__main__":
    key = jax.random.PRNGKey(0)
    kx, kp = jax.random.split(key)

    N, inplanes, planes, H, W = 2, 16, 8, 16, 16   # width=8, out channels=32
    x = jax.random.normal(kx, (N, inplanes, H, W), jnp.float32)
    params = make_params(kp, inplanes, planes)

    out = jax.block_until_ready(mbottleneck_forward(x, params))
    ref = jax.block_until_ready(reference_forward(x, params))

    np.testing.assert_allclose(np.asarray(out), np.asarray(ref), rtol=2e-3, atol=2e-3)
    assert out.shape == (N, planes * 4, H, W)
    print("KERNEL_OK")
</pallas_src>

<mosaic_0001>
module attributes {stable_mosaic.version = 11 : i64} {
  func.func @_mbottleneck_kernel(%arg0: i32, %arg1: i32, %arg2: memref<1x1x10x24x128xbf16, #tpu.memory_space<vmem>>, %arg3: memref<128x128xbf16, #tpu.memory_space<vmem>>, %arg4: memref<1x128xf32, #tpu.memory_space<vmem>>, %arg5: memref<1x128xf32, #tpu.memory_space<vmem>>, %arg6: memref<3x384x128xbf16, #tpu.memory_space<vmem>>, %arg7: memref<1x128xf32, #tpu.memory_space<vmem>>, %arg8: memref<1x128xf32, #tpu.memory_space<vmem>>, %arg9: memref<128x128xbf16, #tpu.memory_space<vmem>>, %arg10: memref<1x128xf32, #tpu.memory_space<vmem>>, %arg11: memref<1x128xf32, #tpu.memory_space<vmem>>, %arg12: memref<1x8x16x128xf32, #tpu.memory_space<vmem>>) attributes {dimension_semantics = [#tpu.dimension_semantics<parallel>, #tpu.dimension_semantics<parallel>], iteration_bounds = array<i64: 2, 2>, scalar_prefetch = 0 : i64, scratch_operands = 0 : i64, tpu.core_type = #tpu.core_type<tc>, window_params = [{transform_indices = @transform_0, window_bounds = array<i64: 1, 1, 10, 24, 128>}, {pipeline_mode = #tpu.pipeline_mode<synchronous>, transform_indices = @transform_1, window_bounds = array<i64: 128, 128>}, {pipeline_mode = #tpu.pipeline_mode<synchronous>, transform_indices = @transform_2, window_bounds = array<i64: 1, 128>}, {pipeline_mode = #tpu.pipeline_mode<synchronous>, transform_indices = @transform_3, window_bounds = array<i64: 1, 128>}, {pipeline_mode = #tpu.pipeline_mode<synchronous>, transform_indices = @transform_4, window_bounds = array<i64: 3, 384, 128>}, {pipeline_mode = #tpu.pipeline_mode<synchronous>, transform_indices = @transform_5, window_bounds = array<i64: 1, 128>}, {pipeline_mode = #tpu.pipeline_mode<synchronous>, transform_indices = @transform_6, window_bounds = array<i64: 1, 128>}, {pipeline_mode = #tpu.pipeline_mode<synchronous>, transform_indices = @transform_7, window_bounds = array<i64: 128, 128>}, {pipeline_mode = #tpu.pipeline_mode<synchronous>, transform_indices = @transform_8, window_bounds = array<i64: 1, 128>}, {pipeline_mode = #tpu.pipeline_mode<synchronous>, transform_indices = @transform_9, window_bounds = array<i64: 1, 128>}, {transform_indices = @transform_10, window_bounds = array<i64: 1, 8, 16, 128>}]} {
    %c0 = arith.constant 0 : index
    %c0_0 = arith.constant 0 : index
    %c0_1 = arith.constant 0 : index
    %c0_2 = arith.constant 0 : index
    %c0_3 = arith.constant 0 : index
    %0 = vector.load %arg2[%c0, %c0_0, %c0_1, %c0_2, %c0_3] : memref<1x1x10x24x128xbf16, #tpu.memory_space<vmem>>, vector<1x1x10x24x128xbf16>
    %1 = vector.shape_cast %0 : vector<1x1x10x24x128xbf16> to vector<10x24x128xbf16>
    %cst = arith.constant 0.000000e+00 : bf16
    %2 = vector.broadcast %cst : bf16 to vector<10x24x128xbf16>
    %3 = arith.maximumf %1, %2 : vector<10x24x128xbf16>
    %4 = vector.shape_cast %3 : vector<10x24x128xbf16> to vector<240x128xbf16>
    %c0_4 = arith.constant 0 : index
    %c0_5 = arith.constant 0 : index
    %5 = vector.load %arg3[%c0_4, %c0_5] : memref<128x128xbf16, #tpu.memory_space<vmem>>, vector<128x128xbf16>
    %cst_6 = arith.constant dense<0.000000e+00> : vector<240x128xf32>
    %6 = tpu.matmul %4, %5, %cst_6 {dimension_numbers = #tpu.dot_dimension_numbers<[1], [0], [0], [1], [0, 0, 1, 1], [], []>} : vector<240x128xbf16>, vector<128x128xbf16>, vector<240x128xf32> -> vector<240x128xf32>
    %c0_7 = arith.constant 0 : index
    %c0_8 = arith.constant 0 : index
    %7 = vector.load %arg4[%c0_7, %c0_8] : memref<1x128xf32, #tpu.memory_space<vmem>>, vector<1x128xf32>
    %8 = vector.broadcast %7 : vector<1x128xf32> to vector<240x128xf32>
    %9 = arith.mulf %6, %8 : vector<240x128xf32>
    %c0_9 = arith.constant 0 : index
    %c0_10 = arith.constant 0 : index
    %10 = vector.load %arg5[%c0_9, %c0_10] : memref<1x128xf32, #tpu.memory_space<vmem>>, vector<1x128xf32>
    %11 = vector.broadcast %10 : vector<1x128xf32> to vector<240x128xf32>
    %12 = arith.addf %9, %11 : vector<240x128xf32>
    %cst_11 = arith.constant 0.000000e+00 : f32
    %13 = vector.broadcast %cst_11 : f32 to vector<240x128xf32>
    %14 = arith.maximumf %12, %13 : vector<240x128xf32>
    %15 = vector.shape_cast %14 : vector<240x128xf32> to vector<10x24x128xf32>
    %16 = tpu.iota {dimensions = array<i32: 0>} : vector<10x24x1xi32>
    %c8_i32 = arith.constant 8 : i32
    %17 = arith.muli %arg1, %c8_i32 : i32
    %18 = vector.broadcast %17 : i32 to vector<10x24x1xi32>
    %19 = arith.addi %16, %18 : vector<10x24x1xi32>
    %c1_i32 = arith.constant 1 : i32
    %20 = vector.broadcast %c1_i32 : i32 to vector<10x24x1xi32>
    %21 = arith.subi %19, %20 : vector<10x24x1xi32>
    %22 = tpu.iota {dimensions = array<i32: 1>} : vector<10x24x1xi32>
    %c0_i32 = arith.constant 0 : i32
    %23 = vector.broadcast %c0_i32 : i32 to vector<10x24x1xi32>
    %24 = arith.cmpi sge, %21, %23 : vector<10x24x1xi32>
    %c16_i32 = arith.constant 16 : i32
    %25 = vector.broadcast %c16_i32 : i32 to vector<10x24x1xi32>
    %26 = arith.cmpi slt, %21, %25 : vector<10x24x1xi32>
    %27 = arith.andi %24, %26 : vector<10x24x1xi1>
    %c1_i32_12 = arith.constant 1 : i32
    %28 = vector.broadcast %c1_i32_12 : i32 to vector<10x24x1xi32>
    %29 = arith.cmpi sge, %22, %28 : vector<10x24x1xi32>
    %30 = arith.andi %27, %29 : vector<10x24x1xi1>
    %c16_i32_13 = arith.constant 16 : i32
    %31 = vector.broadcast %c16_i32_13 : i32 to vector<10x24x1xi32>
    %32 = arith.cmpi sle, %22, %31 : vector<10x24x1xi32>
    %33 = arith.andi %30, %32 : vector<10x24x1xi1>
    %cst_14 = arith.constant 0.000000e+00 : f32
    %34 = vector.shape_cast %33 : vector<10x24x1xi1> to vector<10x24x1xi1>
    %35 = vector.broadcast %34 : vector<10x24x1xi1> to vector<10x24x128xi1>
    %36 = vector.broadcast %cst_14 : f32 to vector<10x24x128xf32>
    %37 = arith.select %35, %15, %36 : vector<10x24x128xi1>, vector<10x24x128xf32>
    %38 = arith.truncf %37 : vector<10x24x128xf32> to vector<10x24x128xbf16>
    %39 = vector.extract_strided_slice %38 {offsets = [0, 0, 0], sizes = [10, 16, 128], strides = [1, 1, 1]} : vector<10x24x128xbf16> to vector<10x16x128xbf16>
    %40 = vector.extract_strided_slice %38 {offsets = [0, 1, 0], sizes = [10, 16, 128], strides = [1, 1, 1]} : vector<10x24x128xbf16> to vector<10x16x128xbf16>
    %41 = vector.extract_strided_slice %38 {offsets = [0, 2, 0], sizes = [10, 16, 128], strides = [1, 1, 1]} : vector<10x24x128xbf16> to vector<10x16x128xbf16>
    %42 = tpu.concatenate %39, %40, %41 in 2 : vector<10x16x128xbf16>, vector<10x16x128xbf16>, vector<10x16x128xbf16> -> vector<10x16x384xbf16>
    %cst_15 = arith.constant 0.000000e+00 : f32
    %43 = vector.broadcast %cst_15 : f32 to vector<128x128xf32>
    %44 = vector.extract_strided_slice %42 {offsets = [0, 0, 0], sizes = [8, 16, 384], strides = [1, 1, 1]} : vector<10x16x384xbf16> to vector<8x16x384xbf16>
    %45 = vector.shape_cast %44 : vector<8x16x384xbf16> to vector<128x384xbf16>
    %c0_16 = arith.constant 0 : index
    %c0_17 = arith.constant 0 : index
    %c0_18 = arith.constant 0 : index
    %46 = vector.load %arg6[%c0_16, %c0_17, %c0_18] : memref<3x384x128xbf16, #tpu.memory_space<vmem>>, vector<1x384x128xbf16>
    %47 = vector.shape_cast %46 : vector<1x384x128xbf16> to vector<384x128xbf16>
    %cst_19 = arith.constant dense<0.000000e+00> : vector<128x128xf32>
    %48 = tpu.matmul %45, %47, %cst_19 {dimension_numbers = #tpu.dot_dimension_numbers<[1], [0], [0], [1], [0, 0, 1, 1], [], []>} : vector<128x384xbf16>, vector<384x128xbf16>, vector<128x128xf32> -> vector<128x128xf32>
    %49 = arith.addf %43, %48 : vector<128x128xf32>
    %50 = vector.extract_strided_slice %42 {offsets = [1, 0, 0], sizes = [8, 16, 384], strides = [1, 1, 1]} : vector<10x16x384xbf16> to vector<8x16x384xbf16>
    %51 = vector.shape_cast %50 : vector<8x16x384xbf16> to vector<128x384xbf16>
    %c1 = arith.constant 1 : index
    %c0_20 = arith.constant 0 : index
    %c0_21 = arith.constant 0 : index
    %52 = vector.load %arg6[%c1, %c0_20, %c0_21] : memref<3x384x128xbf16, #tpu.memory_space<vmem>>, vector<1x384x128xbf16>
    %53 = vector.shape_cast %52 : vector<1x384x128xbf16> to vector<384x128xbf16>
    %cst_22 = arith.constant dense<0.000000e+00> : vector<128x128xf32>
    %54 = tpu.matmul %51, %53, %cst_22 {dimension_numbers = #tpu.dot_dimension_numbers<[1], [0], [0], [1], [0, 0, 1, 1], [], []>} : vector<128x384xbf16>, vector<384x128xbf16>, vector<128x128xf32> -> vector<128x128xf32>
    %55 = arith.addf %49, %54 : vector<128x128xf32>
    %56 = vector.extract_strided_slice %42 {offsets = [2, 0, 0], sizes = [8, 16, 384], strides = [1, 1, 1]} : vector<10x16x384xbf16> to vector<8x16x384xbf16>
    %57 = vector.shape_cast %56 : vector<8x16x384xbf16> to vector<128x384xbf16>
    %c2 = arith.constant 2 : index
    %c0_23 = arith.constant 0 : index
    %c0_24 = arith.constant 0 : index
    %58 = vector.load %arg6[%c2, %c0_23, %c0_24] : memref<3x384x128xbf16, #tpu.memory_space<vmem>>, vector<1x384x128xbf16>
    %59 = vector.shape_cast %58 : vector<1x384x128xbf16> to vector<384x128xbf16>
    %cst_25 = arith.constant dense<0.000000e+00> : vector<128x128xf32>
    %60 = tpu.matmul %57, %59, %cst_25 {dimension_numbers = #tpu.dot_dimension_numbers<[1], [0], [0], [1], [0, 0, 1, 1], [], []>} : vector<128x384xbf16>, vector<384x128xbf16>, vector<128x128xf32> -> vector<128x128xf32>
    %61 = arith.addf %55, %60 : vector<128x128xf32>
    %c0_26 = arith.constant 0 : index
    %c0_27 = arith.constant 0 : index
    %62 = vector.load %arg7[%c0_26, %c0_27] : memref<1x128xf32, #tpu.memory_space<vmem>>, vector<1x128xf32>
    %63 = vector.broadcast %62 : vector<1x128xf32> to vector<128x128xf32>
    %64 = arith.mulf %61, %63 : vector<128x128xf32>
    %c0_28 = arith.constant 0 : index
    %c0_29 = arith.constant 0 : index
    %65 = vector.load %arg8[%c0_28, %c0_29] : memref<1x128xf32, #tpu.memory_space<vmem>>, vector<1x128xf32>
    %66 = vector.broadcast %65 : vector<1x128xf32> to vector<128x128xf32>
    %67 = arith.addf %64, %66 : vector<128x128xf32>
    %cst_30 = arith.constant 0.000000e+00 : f32
    %68 = vector.broadcast %cst_30 : f32 to vector<128x128xf32>
    %69 = arith.maximumf %67, %68 : vector<128x128xf32>
    %70 = arith.truncf %69 : vector<128x128xf32> to vector<128x128xbf16>
    %c0_31 = arith.constant 0 : index
    %c0_32 = arith.constant 0 : index
    %71 = vector.load %arg9[%c0_31, %c0_32] : memref<128x128xbf16, #tpu.memory_space<vmem>>, vector<128x128xbf16>
    %cst_33 = arith.constant dense<0.000000e+00> : vector<128x128xf32>
    %72 = tpu.matmul %70, %71, %cst_33 {dimension_numbers = #tpu.dot_dimension_numbers<[1], [0], [0], [1], [0, 0, 1, 1], [], []>} : vector<128x128xbf16>, vector<128x128xbf16>, vector<128x128xf32> -> vector<128x128xf32>
    %c0_34 = arith.constant 0 : index
    %c0_35 = arith.constant 0 : index
    %73 = vector.load %arg10[%c0_34, %c0_35] : memref<1x128xf32, #tpu.memory_space<vmem>>, vector<1x128xf32>
    %74 = vector.broadcast %73 : vector<1x128xf32> to vector<128x128xf32>
    %75 = arith.mulf %72, %74 : vector<128x128xf32>
    %c0_36 = arith.constant 0 : index
    %c0_37 = arith.constant 0 : index
    %76 = vector.load %arg11[%c0_36, %c0_37] : memref<1x128xf32, #tpu.memory_space<vmem>>, vector<1x128xf32>
    %77 = vector.broadcast %76 : vector<1x128xf32> to vector<128x128xf32>
    %78 = arith.addf %75, %77 : vector<128x128xf32>
    %79 = vector.shape_cast %78 : vector<128x128xf32> to vector<8x16x128xf32>
    %c0_38 = arith.constant 0 : index
    %c0_39 = arith.constant 0 : index
    %c0_40 = arith.constant 0 : index
    %c0_41 = arith.constant 0 : index
    %80 = vector.load %arg12[%c0_38, %c0_39, %c0_40, %c0_41] : memref<1x8x16x128xf32, #tpu.memory_space<vmem>>, vector<1x8x16x128xf32>
    %81 = vector.shape_cast %80 : vector<1x8x16x128xf32> to vector<8x16x128xf32>
    %82 = vector.shape_cast %79 : vector<8x16x128xf32> to vector<1x8x16x128xf32>
    tpu.vector_store %arg12[%c0_38, %c0_39, %c0_40, %c0_41], %82 {strides = array<i32>} : memref<1x8x16x128xf32, #tpu.memory_space<vmem>>, vector<1x8x16x128xf32>,
    return
  }
  func.func @transform_0(%arg0: i32, %arg1: i32) -> (i32, i32, i32, i32, i32) {
    %c0_i32 = arith.constant 0 : i32
    %c0_i32_0 = arith.constant 0 : i32
    %c0_i32_1 = arith.constant 0 : i32
    %c0_i32_2 = arith.constant 0 : i32
    return %arg0, %arg1, %c0_i32, %c0_i32_0, %c0_i32_1 : i32, i32, i32, i32, i32
  }
  func.func @transform_1(%arg0: i32, %arg1: i32) -> (i32, i32) {
    %c0_i32 = arith.constant 0 : i32
    %c0_i32_0 = arith.constant 0 : i32
    %c0_i32_1 = arith.constant 0 : i32
    return %c0_i32, %c0_i32_0 : i32, i32
  }
  func.func @transform_2(%arg0: i32, %arg1: i32) -> (i32, i32) {
    %c0_i32 = arith.constant 0 : i32
    %c0_i32_0 = arith.constant 0 : i32
    %c0_i32_1 = arith.constant 0 : i32
    return %c0_i32, %c0_i32_0 : i32, i32
  }
  func.func @transform_3(%arg0: i32, %arg1: i32) -> (i32, i32) {
    %c0_i32 = arith.constant 0 : i32
    %c0_i32_0 = arith.constant 0 : i32
    %c0_i32_1 = arith.constant 0 : i32
    return %c0_i32, %c0_i32_0 : i32, i32
  }
  func.func @transform_4(%arg0: i32, %arg1: i32) -> (i32, i32, i32) {
    %c0_i32 = arith.constant 0 : i32
    %c0_i32_0 = arith.constant 0 : i32
    %c0_i32_1 = arith.constant 0 : i32
    %c0_i32_2 = arith.constant 0 : i32
    return %c0_i32, %c0_i32_0, %c0_i32_1 : i32, i32, i32
  }
  func.func @transform_5(%arg0: i32, %arg1: i32) -> (i32, i32) {
    %c0_i32 = arith.constant 0 : i32
    %c0_i32_0 = arith.constant 0 : i32
    %c0_i32_1 = arith.constant 0 : i32
    return %c0_i32, %c0_i32_0 : i32, i32
  }
  func.func @transform_6(%arg0: i32, %arg1: i32) -> (i32, i32) {
    %c0_i32 = arith.constant 0 : i32
    %c0_i32_0 = arith.constant 0 : i32
    %c0_i32_1 = arith.constant 0 : i32
    return %c0_i32, %c0_i32_0 : i32, i32
  }
  func.func @transform_7(%arg0: i32, %arg1: i32) -> (i32, i32) {
    %c0_i32 = arith.constant 0 : i32
    %c0_i32_0 = arith.constant 0 : i32
    %c0_i32_1 = arith.constant 0 : i32
    return %c0_i32, %c0_i32_0 : i32, i32
  }
  func.func @transform_8(%arg0: i32, %arg1: i32) -> (i32, i32) {
    %c0_i32 = arith.constant 0 : i32
    %c0_i32_0 = arith.constant 0 : i32
    %c0_i32_1 = arith.constant 0 : i32
    return %c0_i32, %c0_i32_0 : i32, i32
  }
  func.func @transform_9(%arg0: i32, %arg1: i32) -> (i32, i32) {
    %c0_i32 = arith.constant 0 : i32
    %c0_i32_0 = arith.constant 0 : i32
    %c0_i32_1 = arith.constant 0 : i32
    return %c0_i32, %c0_i32_0 : i32, i32
  }
  func.func @transform_10(%arg0: i32, %arg1: i32) -> (i32, i32, i32, i32) {
    %c0_i32 = arith.constant 0 : i32
    %c0_i32_0 = arith.constant 0 : i32
    %c0_i32_1 = arith.constant 0 : i32
    return %arg0, %arg1, %c0_i32, %c0_i32_0 : i32, i32, i32, i32
  }
}

</mosaic_0001>

<bundles_post_ra>
// kernel: tpu_custom_call.1
= control target key start
LH: loop header
LB: loop body
LE: loop exit
PB: predicated region body
PF: predicated region fallthrough
CT: control target
= control target key end

     0   :  { %s5414_s0 = inlined_call_operand.hbm [shape: bf16[2,2,10,24,128], index: 0, kind: input, shape index: {}]   ;;  %s5415_s1 = inlined_call_operand.hbm [shape: bf16[128,128], index: 1, kind: input, shape index: {}]   ;;  %s5416_s2 = inlined_call_operand.vmem [shape: f32[1,128], index: 2, kind: input, shape index: {}]   ;;  %s5417_s3 = inlined_call_operand.vmem [shape: f32[1,128], index: 3, kind: input, shape index: {}]   ;;  %s5418_s4 = inlined_call_operand.hbm [shape: bf16[3,384,128], index: 4, kind: input, shape index: {}]   ;;  %s5419_s5 = inlined_call_operand.vmem [shape: f32[1,128], index: 5, kind: input, shape index: {}]   ;;  %s5420_s6 = inlined_call_operand.vmem [shape: f32[1,128], index: 6, kind: input, shape index: {}]   ;;  %s5421_s7 = inlined_call_operand.hbm [shape: bf16[128,128], index: 7, kind: input, shape index: {}]   ;;  %s5422_s8 = inlined_call_operand.vmem [shape: f32[1,128], index: 8, kind: input, shape index: {}]   ;;  %s5423_s9 = inlined_call_operand.vmem [shape: f32[1,128], index: 9, kind: input, shape index: {}]   ;;  %s5424_s10 = inlined_call_operand.hbm [shape: f32[2,16,16,128], index: 10, kind: output, shape index: {}]  }
   0x1   :  { %5442 = sst [smem:[#allocation18_spill]] %s5415_s1 }
   0x2   :  { %5443 = sst [smem:[#allocation19_spill]] %s5417_s3 }
   0x3   :  { %5444 = sst [smem:[#allocation20_spill]] %s5418_s4 }
   0x4   :  { %5445 = sst [smem:[#allocation21_spill]] %s5419_s5 }
   0x5   :  { %5446 = sst [smem:[#allocation22_spill]] %s5420_s6 }
   0x6   :  { %5447 = sst [smem:[#allocation23_spill]] %s5422_s8 }
   0x7   :  { %5448 = sst [smem:[#allocation24_spill]] %s5423_s9 }
   0x8   :  { %5449 = sst [smem:[#allocation25_spill]] %s5424_s10 }
   0x9   :  { %15 = vsyncpa [#allocation3], 0 }
   0xa   :  { %17 = vsyncpa [#allocation3 + $0x1], 0 }
   0xb   :  { %18 = vsyncpa [#allocation6], 0 }
   0xc   :  { %19 = vsyncpa [#allocation9], 0 }
   0xd   :  { %20 = vsyncpa [#allocation4], 0 }
   0xe   :  { %22 = vsyncpa [#allocation4 + $0x1], 0  ;;  %s4211_s13 = smov 0   ;;  %s4213_s14 = smov 0  }
   0xf   :  { %s4215_s15 = smov 0   ;;  %s4217_s16 = smov 0  }
  0x10   :  { %s4219_s17 = smov 0   ;;  %s4221_s18 = smov 0  }
  0x11   :  { %s4223_s19 = smov 0   ;;  %s4225_s20 = smov 0  }
  0x12 LB: > { %5450 = sst [smem:[#allocation15_spill]] %s4114_s13  ;;  %s2939_s21 = sadd.s32 4294967295, %s4142_s20   ;;  %s4142_s20 = sphi %s4225_s20, %s28_s20   ;;  %s4138_s19 = sphi %s4223_s19, %s5556_s19   ;;  %s4134_s18 = sphi %s4221_s18, %s5555_s18   ;;  %s4130_s17 = sphi %s4219_s17, %s5554_s17   ;;  %s4126_s16 = sphi %s4217_s16, %s5553_s16   ;;  %s4122_s15 = sphi %s4215_s15, %s5552_s15   ;;  %s4118_s14 = sphi %s4213_s14, %s5551_s14   ;;  %s4114_s13 = sphi %s4211_s13, %s5550_s13  }
  0x13   : > { %5451 = sst [smem:[#allocation16_spill]] %s4130_s17  ;;  %s2940_s22 = sadd.s32 4294967294, %s4142_s20  }
  0x14   : > { %p62_p0 = scmp.ne.s32.totalorder %s4118_s14, %s4114_s13  ;;  %p4255_p1 = scmp.eq.s32.totalorder %s2939_s21, 0 }
  0x15   : > { %p4259_p2 = scmp.eq.s32.totalorder %s2939_s21, 3  ;;  %p283_p3 = scmp.eq.s32.totalorder %s2940_s22, 3 }
  0x16   : > { %s5452_s23 = scalar_select %p4255_p1, 1, 0 }
  0x17   : > { %s5453_s24 = scalar_select %p4259_p2, 1, 0 }
  0x18   : > { %p4265_p4 = por %p4255_p1, %p62_p0  ;;  %p2941_p5 = scmp.ge.s32.totalorder %s4142_s20, 1 }
  0x19   : > { %p4270_p6 = por %p283_p3, %p62_p0  ;;  %p290_p7 = scmp.lt.s32.totalorder %s4142_s20, 5 }
  0x1a   : > { %s5454_s25 = scalar_select %p4265_p4, 1, 0 }
  0x1b   : > { %s5455_s26 = scalar_select %p4270_p6, 1, 0 }
  0x1c   : > { %p4275_p8 = pnand %p2941_p5, %p290_p7  ;;  %s4144_s28 = smov [#allocation5]  }
  0x1d   : > { %5456 = sst [smem:[#allocation17_spill]] %s5455_s26  ;;  %s302_s29 = sshll.u32 %s4144_s28, 4  ;;  %s4279_s29 = int_to_ptr.vmem [resolvable:$true] %s302_s29 }
  0x1e   : > { %s5457_s27 = scalar_select %p4275_p8, 1, 0 }
  0x1f   : > { %p3734_p9 = pneg %p4275_p8  ;;  %s4145_s11 = smov [#allocation7]  }
  0x20   : > { %s321_s12 = sshll.u32 %s4145_s11, 4  ;;  %s4146_s21 = smov [#allocation8]   ;;  %s4289_s12 = int_to_ptr.vmem [resolvable:$true] %s321_s12 }
  0x21   : > { %p4285_p10 = pnand %p3734_p9, %p4255_p1  ;;  %s4291_s22 = sshll.u32 %s4146_s21, 4  ;;  %s341_s22 = int_to_ptr.vmem [resolvable:$true] %s4291_s22 }
  0x22   : > { %s5459_s1 = sld [smem:[#allocation18_spill]] }
  0x23   : > { %p4301_p12 = pneg %p4285_p10 }
  0x28   : > { %s3922_s28 = scalar_lea.hbm %s5459_s1, 1024 }
  0x29   : > { %p3923_p11 = scmp.ne.s32.totalorder %s5459_s1, %s3922_s28  ;;  %p3929_p3 = scmp.lt.u32.totalorder %s3922_s28, %s5459_s1 }
  0x2b   : > { %p3925_p13 = pnand %p4301_p12, %p3923_p11 }
  0x2d   : > { %p3926_p0 = pneg %p3925_p13 }
  0x2f   : > { %p3931_p5 = pnand %p3929_p3, %p3926_p0 }
  0x31   : > { %3934 = shalt.err (!%p3931_p5)
}
  0x32   : > { %s3935_s10 = scalar_lea.vmem %s4279_s29, 1024  ;;  %p3943_p1 = scmp.lt.s32.totalorder %s4279_s29, %s4279_s29 }
  0x33   : > { %p3936_p7 = scmp.ne.s32.totalorder %s4279_s29, %s3935_s10  ;;  %p3944_p4 = scmp.lt.s32.totalorder %s3935_s10, %s3935_s10 }
  0x35   : > { %p3938_p9 = pnand %p3936_p7, %p4301_p12  ;;  %p3945_p11 = por %p3944_p4, %p3943_p1 }
  0x37   : > { %p3939_p6 = pneg %p3938_p9 }
  0x39   : > { %p3946_p13 = pnand %p3945_p11, %p3939_p6 }
  0x3b   : > { %3949 = shalt.err (!%p3946_p13)
}
  0x3c   : > { %s5432_s13 = smov 64   ;;  %s5433_s17 = smov 4  }
  0x3d   : > { %3737 = dma.hbm_to_vmem [thread:$0]  (!%p4285_p10), %s5459_s1, 1024, %s4279_s29, [#allocation6], %s5432_s13, %s5432_s13, %s5433_s17  }
  0x3e   : > { %s5461_s4 = sld [smem:[#allocation20_spill]] }
  0x44   : > { %s3950_s10 = scalar_lea.hbm %s5461_s4, 9216 }
  0x45   : > { %p3951_p1 = scmp.ne.s32.totalorder %s5461_s4, %s3950_s10  ;;  %p3957_p0 = scmp.lt.u32.totalorder %s3950_s10, %s5461_s4 }
  0x47   : > { %p3953_p4 = pnand %p3951_p1, %p4301_p12 }
  0x49   : > { %p3954_p6 = pneg %p3953_p4 }
  0x4b   : > { %p3959_p3 = pnand %p3957_p0, %p3954_p6 }
  0x4d   : > { %3962 = shalt.err (!%p3959_p3)
}
  0x4e   : > { %s3963_s29 = scalar_lea.vmem %s4289_s12, 9216  ;;  %p3971_p11 = scmp.lt.s32.totalorder %s4289_s12, %s4289_s12 }
  0x4f   : > { %p3964_p5 = scmp.ne.s32.totalorder %s4289_s12, %s3963_s29  ;;  %p3972_p13 = scmp.lt.s32.totalorder %s3963_s29, %s3963_s29 }
  0x51   : > { %p3966_p7 = pnand %p3964_p5, %p4301_p12  ;;  %p3973_p1 = por %p3972_p13, %p3971_p11 }
  0x53   : > { %p3967_p9 = pneg %p3966_p7 }
  0x55   : > { %p3974_p4 = pnand %p3973_p1, %p3967_p9 }
  0x57   : > { %3977 = shalt.err (!%p3974_p4)
}
  0x58   : > { %3740 = dma.hbm_to_vmem [thread:$0]  (!%p4285_p10), %s5461_s4, 9216, %s4289_s12, [#allocation6], %s5432_s13, %s5432_s13, %s5433_s17  }
  0x59   : > { %s3978_s26 = scalar_lea.hbm %s5421_s7, 1024 }
  0x5a   : > { %p3979_p6 = scmp.ne.s32.totalorder %s5421_s7, %s3978_s26  ;;  %p3985_p5 = scmp.lt.u32.totalorder %s3978_s26, %s5421_s7 }
  0x5c   : > { %p3981_p0 = pnand %p3979_p6, %p4301_p12 }
  0x5e   : > { %p3982_p3 = pneg %p3981_p0 }
  0x60   : > { %p3987_p7 = pnand %p3985_p5, %p3982_p3 }
  0x62   : > { %3990 = shalt.err (!%p3987_p7)
}
  0x63   : > { %s3991_s29 = scalar_lea.vmem %s341_s22, 1024  ;;  %p3999_p1 = scmp.lt.s32.totalorder %s341_s22, %s341_s22 }
  0x64   : > { %p3992_p9 = scmp.ne.s32.totalorder %s341_s22, %s3991_s29  ;;  %p4000_p4 = scmp.lt.s32.totalorder %s3991_s29, %s3991_s29 }
  0x66   : > { %p3994_p11 = pnand %p3992_p9, %p4301_p12  ;;  %p4001_p8 = por %p4000_p4, %p3999_p1 }
  0x68   : > { %p3995_p13 = pneg %p3994_p11 }
  0x6a   : > { %p4002_p2 = pnand %p4001_p8, %p3995_p13 }
  0x6c   : > { %4005 = shalt.err (!%p4002_p2)
}
  0x6d   : > { %3743 = dma.hbm_to_vmem [thread:$0]  (!%p4285_p10), %s5421_s7, 1024, %s341_s22, [#allocation9], %s5432_s13, %s5432_s13, %s5433_s17  }
  0x6e   : > { %s37_s9 = sadd.s32 1, %s4134_s18  ;;  %s40_s30 = sadd.s32 1, %s4138_s19 }
  0x6f   : > { %p38_p2 = scmp.ge.s32.totalorder %s37_s9, 2  ;;  %s49_s5 = sadd.s32 1, %s4122_s15 }
  0x70   : > { %p56_p8 = scmp.ne.s32.totalorder %s4122_s15, %s4118_s14  ;;  %p57_p12 = scmp.eq.s32.totalorder %s4142_s20, 0 }
  0x71   : > { %s5558_s9 = smov (%p38_p2, %s37_s9), 0  ;;  %s5560_s30 = smov (!%p38_p2, %s40_s30), %s4138_s19 }
  0x72   : > { %s45_s6 = ssub.s32 %s4134_s18, %s5558_s9  ;;  %p42_p6 = scmp.ge.s32.totalorder %s5560_s30, 2 }
  0x73   : > { %p5462_p0 = scmp.ne.s32.totalorder %s5453_s24, 0  ;;  %p58_p10 = por %p57_p12, %p56_p8 }
  0x74   : > { %p3755_p5 = scmp.lt.s32.totalorder %s4142_s20, 4  ;;  %s5562_s30 = smov (%p42_p6, %s5560_s30), 0 }
  0x75   : > { %p4386_p3 = por %p5462_p0, %p56_p8  ;;  %s360_s22 = sand.u32 1, %s4122_s15  }
  0x76   : > { %s3715_s26 = smul.u32 30, %s4134_s18  ;;  %s44_s28 = ssub.s32 %s4138_s19, %s5562_s30 }
  0x77   : > { %s46_s11 = sor.u32 %s45_s6, %s44_s28  ;;  %s3714_s21 = smul.u32 120, %s360_s22 }
  0x78   : > { %p47_p7 = scmp.eq.s32.totalorder %s46_s11, 0  ;;  %s3716_s10 = smul.u32 60, %s4138_s19 }
  0x79   : > { %p4398_p9 = pnand %p3755_p5, %p58_p10  ;;  %s364_s3 = scalar_lea.vmem [#allocation2], %s3714_s21 }
  0x7a   : > { %s4403_s24 = scalar_select %p47_p7, %s4122_s15, %s49_s5  }
  0x7b   : > { %s370_s12 = sadd.s32 %s3716_s10, %s3715_s26  ;;  %s373_s13 = sshll.u32 %s364_s3, 4  ;;  %s4405_s13 = int_to_ptr.vmem [resolvable:$true] %s373_s13 }
  0x7c   : > { %s2946_s17 = sshll.u32 %s370_s12, 6  ;;  %s4412_s28 = scalar_lea.sflag [#allocation3], %s360_s22 }
  0x7d   : > { %s4410_s6 = scalar_lea.hbm %s5414_s0, %s2946_s17  ;;  %p4008_p13 = pneg %p4398_p9 }
  0x7e   : > { %s4006_s11 = scalar_lea.hbm %s4410_s6, 1920  ;;  %s4011_s1 = scalar_lea.hbm %s5414_s0, 7680 }
  0x7f   : > { %p4007_p11 = scmp.ne.s32.totalorder %s4410_s6, %s4006_s11  ;;  %p4012_p2 = scmp.lt.u32.totalorder %s4410_s6, %s5414_s0 }
  0x80   : > { %p4013_p8 = scmp.lt.u32.totalorder %s4011_s1, %s4006_s11  ;;  %p4015_p6 = scmp.lt.u32.totalorder %s4006_s11, %s4410_s6 }
  0x81   : > { %p4009_p1 = pnand %p4008_p13, %p4007_p11 }
  0x82   : > { %p4014_p12 = por %p4013_p8, %p4012_p2 }
  0x83   : > { %p4010_p4 = pneg %p4009_p1 }
  0x84   : > { %p4016_p0 = por %p4015_p6, %p4014_p12 }
  0x86   : > { %p4017_p10 = pnand %p4016_p0, %p4010_p4 }
  0x88   : > { %4020 = shalt.err (!%p4017_p10)
}
  0x89   : > { %s4021_s22 = scalar_lea.vmem %s4405_s13, 1920  ;;  %s4149_s21 = smov [#allocation2]  }
  0x8a   : > { %p4022_p5 = scmp.ne.s32.totalorder %s4405_s13, %s4021_s22  ;;  %s4026_s10 = sshll.u32 %s4149_s21, 4  ;;  %s4027_s10 = int_to_ptr.vmem [resolvable:$false] %s4026_s10 }
  0x8b   : > { %s4028_s12 = scalar_lea.vmem %s4027_s10, 3840  ;;  %p4029_p1 = scmp.lt.s32.totalorder %s4405_s13, %s4027_s10 }
  0x8c   : > { %p4024_p7 = pnand %p4022_p5, %p4008_p13  ;;  %p4030_p2 = scmp.lt.s32.totalorder %s4028_s12, %s4021_s22 }
  0x8e   : > { %p4025_p11 = pneg %p4024_p7  ;;  %p4031_p8 = por %p4030_p2, %p4029_p1 }
  0x90   : > { %p4032_p12 = pnand %p4031_p8, %p4025_p11 }
  0x92   : > { %4035 = shalt.err (!%p4032_p12)
}
  0x93   : > { %s5465_s3 = smov 4   ;;  %s5466_s11 = smov 64  }
  0x94   : > { %3747 = dma.hbm_to_vmem [thread:$0]  (!%p4398_p9), %s4410_s6, 1920, %s4405_s13, %s4412_s28, %s5466_s11, %s5466_s11, %s5465_s3  }
  0x95   : > { %p5467_p13 = scmp.ne.s32.totalorder %s5457_s27, 0 }
  0x96   : > { %s4446_s5 = sand.u32 (!%p5467_p13), 1, %s4118_s14   ;;  %p5468_p4 = scmp.ne.s32.totalorder (!%p5467_p13), %s5454_s25, 0 }
  0x97   : > { %385 = sbr.rel (%p5467_p13) target bundleno = 1148 (0x47c), region = 60  ;;  %s388_s1 = scalar_lea.sflag (!%p5467_p13), [#allocation3], %s4446_s5 }
  0x98   : > { %s3717_s26 = smul.u32 (!%p5467_p13), 120, %s4446_s5 }
  0x9a   : > { %s4450_s4 = scalar_lea.vmem (!%p5467_p13), [#allocation2], %s3717_s26 }
  0x9e   : > { %4097 = dma.done.wait (%p5468_p4), %s388_s1, 1920  }
  0x9f   : > { %4099 = vsyncadd (%p5468_p4), %s388_s1, 4294965376  ;;  %p5469_p9 = scmp.ne.s32.totalorder %s5452_s23, 0 }
  0xa1   : > { %4101 = dma.done.wait (%p5469_p9), [#allocation6], 10240  }
  0xa2   : > { %4103 = vsyncadd (%p5469_p9), [#allocation6], 4294957056 }
  0xa3   : > { %4105 = dma.done.wait (%p5469_p9), [#allocation9], 1024  }
  0xa4   : > { %4107 = vsyncadd (%p5469_p9), [#allocation9], 4294966272  ;;  %v4150_v0 = vmov 0.0   ;;  %vm4151_vm0 = vmmov 0   ;;  %v3834_v1 = vld [vmem:[#allocation5] sm:$0xff]   ;;  %v3835_v2 = vld [vmem:[#allocation5 + $0x8] sm:$0xff]  }
  0xa5   : > { %3430 = vmatprep.subr.bf16.mxu0 %v4150_v0  ;;  %3446 = vmatprep.mubr.msk.bf16.mxu0 %vm4151_vm0, %v4150_v0  ;;  %v3836_v3 = vld [vmem:[#allocation5 + $0x10] sm:$0xff]   ;;  %v3837_v4 = vld [vmem:[#allocation5 + $0x18] sm:$0xff]   ;;  %v3838_v5 = vld [vmem:[#allocation5 + $0x20] sm:$0xff]   ;;  %v4152_v11 = vmov 0   ;;  %s2977_s23 = sshll.u32 %s4126_s16, 3  ;;  %s5470_s6 = sld [smem:[#allocation19_spill]] }
  0xa6   : > { %3431 = vmatpush3.bf16.msra.mxu0 %v3834_v1  ;;  %v3839_v6 = vld [vmem:[#allocation5 + $0x28] sm:$0xff]   ;;  %v3840_v7 = vld [vmem:[#allocation5 + $0x30] sm:$0xff]   ;;  %v3841_v10 = vld [vmem:[#allocation5 + $0x38] sm:$0xff]   ;;  %vm5437_vm11 = vcmask 1046528   ;;  %vm5436_vm12 = vsmask.f32 7424 }
  0xa7   : > { %3432 = vmatprep.subr.bf16.mxu0 %v4150_v0  ;;  %v442_v8 = vld [vmem:[%s4450_s4] sm:$0xf]  ;;  %v443_v9 = vld [vmem:[%s4450_s4 + $0x4] sm:$0xf]  ;;  %v444_v14 = vld [vmem:[%s4450_s4 + $0x8] sm:$0xf] }
  0xa8   : > { %v472_v12 = vmax.bf16 %v4152_v11, %v442_v8  ;;  %v473_v13 = vmax.bf16 %v4152_v11, %v443_v9  ;;  %v445_v15 = vld [vmem:[%s4450_s4 + $0xc] sm:$0xf]  ;;  %v474_v17 = vmax.bf16 %v4152_v11, %v444_v14  ;;  %v446_v19 = vld [vmem:[%s4450_s4 + $0x10] sm:$0xf]  ;;  %v447_v20 = vld [vmem:[%s4450_s4 + $0x14] sm:$0xf] }
  0xa9   : > { %v475_v18 = vmax.bf16 %v4152_v11, %v445_v15  ;;  %v476_v22 = vmax.bf16 %v4152_v11, %v446_v19  ;;  %v477_v23 = vmax.bf16 %v4152_v11, %v447_v20  ;;  %v448_v24 = vld [vmem:[%s4450_s4 + $0x18] sm:$0xf]  ;;  %v449_v25 = vld [vmem:[%s4450_s4 + $0x1c] sm:$0xf]  ;;  %v450_v29 = vld [vmem:[%s4450_s4 + $0x20] sm:$0xf] }
  0xaa   : > { %3433 = vmatpush3.bf16.msra.mxu0 %v3835_v2  ;;  %v2952_v16 = vcombine.low %v472_v12, %v473_v13  ;;  %v478_v27 = vmax.bf16 %v4152_v11, %v448_v24  ;;  %v479_v28 = vmax.bf16 %v4152_v11, %v449_v25  ;;  %v451_v30 = vld [vmem:[%s4450_s4 + $0x24] sm:$0xf]  ;;  %v480_v32 = vmax.bf16 %v4152_v11, %v450_v29  ;;  %v452_v34 = vld [vmem:[%s4450_s4 + $0x28] sm:$0xf]  ;;  %v453_v35 = vld [vmem:[%s4450_s4 + $0x2c] sm:$0xf] }
  0xab   : > { %3434 = vmatprep.subr.bf16.mxu0 %v4150_v0  ;;  %v2953_v21 = vcombine.low %v474_v17, %v475_v18  ;;  %v2954_v26 = vcombine.low %v476_v22, %v477_v23  ;;  %v481_v33 = vmax.bf16 %v4152_v11, %v451_v30  ;;  %v482_v37 = vmax.bf16 %v4152_v11, %v452_v34  ;;  %v454_v39 = vld [vmem:[%s4450_s4 + $0x30] sm:$0xf]  ;;  %v455_v40 = vld [vmem:[%s4450_s4 + $0x34] sm:$0xf]  ;;  %v456_v45 = vld [vmem:[%s4450_s4 + $0x38] sm:$0xf] }
  0xac   : > { %v2955_v31 = vcombine.low %v478_v27, %v479_v28  ;;  %v483_v38 = vmax.bf16 %v4152_v11, %v453_v35  ;;  %v484_v42 = vmax.bf16 %v4152_v11, %v454_v39  ;;  %v485_v43 = vmax.bf16 %v4152_v11, %v455_v40  ;;  %v457_v46 = vld [vmem:[%s4450_s4 + $0x3c] sm:$0xf]  ;;  %v458_v50 = vld [vmem:[%s4450_s4 + $0x40] sm:$0xf]  ;;  %v459_v51 = vld [vmem:[%s4450_s4 + $0x44] sm:$0xf] }
  0xad   : > { %v2956_v36 = vcombine.low %v480_v32, %v481_v33  ;;  %v486_v47 = vmax.bf16 %v4152_v11, %v456_v45  ;;  %v487_v48 = vmax.bf16 %v4152_v11, %v457_v46  ;;  %v488_v52 = vmax.bf16 %v4152_v11, %v458_v50  ;;  %v460_v55 = vld [vmem:[%s4450_s4 + $0x48] sm:$0xf]  ;;  %v461_v56 = vld [vmem:[%s4450_s4 + $0x4c] sm:$0xf]  ;;  %v462_v60 = vld [vmem:[%s4450_s4 + $0x50] sm:$0xf] }
  0xae   : > { %3435 = vmatpush3.bf16.msra.mxu0 %v3836_v3  ;;  %v2957_v41 = vcombine.low %v482_v37, %v483_v38  ;;  %v2958_v44 = vcombine.low %v484_v42, %v485_v43  ;;  %v489_v53 = vmax.bf16 %v4152_v11, %v459_v51  ;;  %v490_v57 = vmax.bf16 %v4152_v11, %v460_v55  ;;  %v463_v61 = vld [vmem:[%s4450_s4 + $0x54] sm:$0xf]  ;;  %v464_v2 = vld [vmem:[%s4450_s4 + $0x58] sm:$0xf]  ;;  %v465_v3 = vld [vmem:[%s4450_s4 + $0x5c] sm:$0xf] }
  0xaf   : > { %3436 = vmatprep.subr.bf16.mxu0 %v4150_v0  ;;  %v2959_v49 = vcombine.low %v486_v47, %v487_v48  ;;  %v491_v58 = vmax.bf16 %v4152_v11, %v461_v56  ;;  %v492_v62 = vmax.bf16 %v4152_v11, %v462_v60  ;;  %v493_v63 = vmax.bf16 %v4152_v11, %v463_v61  ;;  %v3843_v8 = vld [vmem:[#allocation7 + $0xc0] sm:$0xff]   ;;  %v466_v9 = vld [vmem:[%s4450_s4 + $0x60] sm:$0xf]  ;;  %v468_v19 = vld [vmem:[%s4450_s4 + $0x68] sm:$0xf]  ;;  %s5541_s22 = sld [smem:[#allocation21_spill]] }
  0xb0   : > { %v2960_v54 = vcombine.low %v488_v52, %v489_v53  ;;  %v3844_v12 = vld [vmem:[#allocation7 + $0x108] sm:$0xff]   ;;  %v496_v13 = vmax.bf16 %v4152_v11, %v466_v9  ;;  %v3847_v18 = vld [vmem:[#allocation7 + $0xd0] sm:$0xff]   ;;  %v498_v22 = vmax.bf16 %v4152_v11, %v468_v19  ;;  %v3849_v24 = vld [vmem:[#allocation7 + $0xd8] sm:$0xff]   ;;  %v932_v55 = vlaneseq  ;;  %s5542_s12 = sld [smem:[#allocation22_spill]]  ;;  %s5543_s26 = sld [smem:[#allocation23_spill]] }
  0xb1   : > { %v2961_v59 = vcombine.low %v490_v57, %v491_v58  ;;  %v2962_v1 = vcombine.low %v492_v62, %v493_v63  ;;  %v3845_v15 = vld [vmem:[#allocation7 + $0xc8] sm:$0xff]   ;;  %v469_v20 = vld [vmem:[%s4450_s4 + $0x6c] sm:$0xf]  ;;  %v3850_v25 = vld [vmem:[#allocation7 + $0x1c0] sm:$0xff]   ;;  %s2951_s1 = sshll.u32 %s4446_s5, 7  ;;  %s5544_s25 = sld [smem:[#allocation24_spill]] }
  0xb2   : > { %3437 = vmatpush3.bf16.msra.mxu0 %v3837_v4  ;;  %v494_v4 = vmax.bf16 %v4152_v11, %v464_v2  ;;  %v499_v23 = vmax.bf16 %v4152_v11, %v469_v20  ;;  %v3852_v27 = vld [vmem:[#allocation7 + $0x120] sm:$0xff]   ;;  %v3854_v32 = vld [vmem:[#allocation7 + $0x1c8] sm:$0xff]   ;;  %v3858_v38 = vld [vmem:[#allocation7 + $0x1d0] sm:$0xff]   ;;  %v4574_v58 = vshrl.u32 %v932_v55, 7  ;;  %s5308_s27 = scalar_lea.vmem [#allocation10], %s2951_s1  ;;  %s5545_s13 = sld [smem:[#allocation16_spill]] }
  0xb3   : > { %3438 = vmatprep.subr.bf16.mxu0 %v4150_v0  ;;  %v3853_v29 = vld [vmem:[#allocation7 + $0xe0] sm:$0xff]   ;;  %v3855_v33 = vld [vmem:[#allocation7 + $0x188] sm:$0xff]   ;;  %v3859_v39 = vld [vmem:[#allocation7 + $0x190] sm:$0xff]   ;;  %s3150_s29 = sshll.u32 %s4126_s16, 4  ;;  %s2820_s17 = sshll.u32 %s5308_s27, 4  ;;  %s5356_s17 = int_to_ptr.vmem [resolvable:$true] %s2820_s17 }
  0xb4   : > { %v2965_v28 = vcombine.low %v498_v22, %v499_v23  ;;  %v470_v30 = vld [vmem:[%s4450_s4 + $0x70] sm:$0xf]  ;;  %v3856_v34 = vld [vmem:[#allocation7 + $0x128] sm:$0xff]   ;;  %v3860_v40 = vld [vmem:[#allocation7 + $0x130] sm:$0xff]   ;;  %vm5438_vm4 = vcmp.ge.s32.totalorder %v4574_v58, 1  ;;  %s5546_s10 = sld [smem:[#allocation25_spill]] }
  0xb5   : > { %v500_v35 = vmax.bf16 %v4152_v11, %v470_v30  ;;  %v3857_v37 = vld [vmem:[#allocation7 + $0xe8] sm:$0xff]   ;;  %v3861_v42 = vld [vmem:[#allocation7 + $0xf0] sm:$0xff]   ;;  %v3862_v43 = vld [vmem:[#allocation7 + $0x1d8] sm:$0xff]   ;;  %s2804_s3 = scalar_lea.sflag [#allocation4], %s4446_s5  ;;  %s4036_s11 = scalar_lea.vmem %s5356_s17, 2048 }
  0xb6   : > { %3439 = vmatpush3.bf16.msra.mxu0 %v3838_v5  ;;  %v495_v5 = vmax.bf16 %v4152_v11, %v465_v3  ;;  %v3865_v45 = vld [vmem:[#allocation7 + $0xf8] sm:$0xff]   ;;  %v3867_v46 = vld [vmem:[#allocation7 + $0x1a0] sm:$0xff]   ;;  %v3868_v47 = vld [vmem:[#allocation7 + $0x1e8] sm:$0xff]   ;;  %p4037_p6 = scmp.ne.s32.totalorder %s5356_s17, %s4036_s11 }
  0xb7   : > { %3440 = vmatprep.subr.bf16.mxu0 %v4150_v0  ;;  %v3869_v48 = vld [vmem:[#allocation7 + $0x1a8] sm:$0xff]   ;;  %v3871_v50 = vld [vmem:[#allocation7 + $0x1b0] sm:$0xff]   ;;  %v3872_v51 = vld [vmem:[#allocation7 + $0x1f8] sm:$0xff]  }
  0xb8   : > { %v3873_v52 = vld [vmem:[#allocation7 + $0x1b8] sm:$0xff]   ;;  %v4562_v53 = vld [vmem:[#allocation7 + $0x140] sm:$0xff]   ;;  %v4572_v57 = vld [vmem:[%s5416_s2] ss:$0 sm:$0xff]  ;;  %p4038_p0 = pnand %p4037_p6, %p4386_p3 }
  0xb9   : > { %v4579_v60 = vld [vmem:[%s5470_s6] ss:$0 sm:$0xff]  ;;  %v3902_v2 = vld [vmem:[#allocation7 + $0xa0] sm:$0xff]   ;;  %v3905_v30 = vld [vmem:[#allocation7 + $0xb8] sm:$0xff]   ;;  %s3146_s6 = sshll.u32 %s5545_s13, 5 }
  0xba   : > { %3441 = vmatpush3.bf16.msra.mxu0 %v3839_v6  ;;  %v3842_v6 = vld [vmem:[#allocation7 + $0x100] sm:$0xff]   ;;  %s2817_s28 = sadd.s32 %s3150_s29, %s3146_s6  ;;  %p4039_p10 = pneg %p4038_p0 }
  0xbb   : > { %3442 = vmatprep.subr.bf16.mxu0 %v4150_v0  ;;  %3174 = vmatprep.subr.bf16.mxu1 %v3842_v6  ;;  %s3147_s16 = sshll.u32 %s2817_s28, 7 }
  0xbc   : > { %3175 = vmatpush3.bf16.msra.mxu1 %v3843_v8  ;;  %v3903_v8 = vld [vmem:[#allocation7 + $0xa8] sm:$0xff]  }
  0xbd   : > { %3176 = vmatprep.subr.bf16.mxu1 %v3844_v12 }
  0xbe   : > { %3443 = vmatpush3.bf16.msra.mxu0 %v3840_v7  ;;  %v2963_v7 = vcombine.low %v494_v4, %v495_v5  ;;  %v4590_v5 = vadd.s32 16, %v4574_v58 }
  0xbf   : > { %3444 = vmatprep.subr.bf16.mxu0 %v4150_v0 }
  0xc0   : > { %3177 = vmatpush3.bf16.msra.mxu1 %v3845_v15  ;;  %vm5435_vm6 = vcmp.le.s32.totalorder %v4590_v5, 16 }
  0xc2   : > { %3445 = vmatpush3.bf16.msra.mxu0 %v3841_v10  ;;  %v467_v10 = vld [vmem:[%s4450_s4 + $0x64] sm:$0xf] }
  0xc3   : > { %v497_v14 = vmax.bf16 %v4152_v11, %v467_v10  ;;  %3334 = vmatprep.subr.bf16.mxu0 %v3850_v25 }
  0xc5   : > { %3447 = vmatmul.mubr.bf16.vlgmr.msra.gmra.mrb[0].mxu0 %v2952_v16  ;;  %v3846_v16 = vld [vmem:[#allocation7 + $0x110] sm:$0xff]   ;;  %v2964_v17 = vcombine.low %v496_v13, %v497_v14 }
  0xc6   : > { %3450 = vmatprep.mubr.msk.bf16.mxu0 %vm4151_vm0, %v4150_v0  ;;  %3178 = vmatprep.subr.bf16.mxu1 %v3846_v16 }
  0xc7   : > { %3179 = vmatpush3.bf16.msra.mxu1 %v3847_v18 }
  0xcd   : > { %3451 = vmatmul.mubr.bf16.gmra.mrb[4].mxu0 %v2953_v21  ;;  %v3848_v21 = vld [vmem:[#allocation7 + $0x118] sm:$0xff]  }
  0xce   : > { %3454 = vmatprep.mubr.msk.bf16.mxu0 %vm4151_vm0, %v4150_v0  ;;  %3180 = vmatprep.subr.bf16.mxu1 %v3848_v21 }
  0xcf   : > { %3181 = vmatpush3.bf16.msra.mxu1 %v3849_v24 }
  0xd0   : > { %3182 = vmatprep.subr.bf16.mxu1 %v3852_v27 }
  0xd3   : > { %3183 = vmatpush3.bf16.msra.mxu1 %v3853_v29 }
  0xd4   : > { %3184 = vmatprep.subr.bf16.mxu1 %v3856_v34 }
  0xd5   : > { %3455 = vmatmul.mubr.bf16.gmra.mrb[8].mxu0 %v2954_v26  ;;  %v3851_v26 = vld [vmem:[#allocation7 + $0x180] sm:$0xff]  }
  0xd6   : > { %3458 = vmatprep.mubr.msk.bf16.mxu0 %vm4151_vm0, %v4150_v0  ;;  %3335 = vmatpush3.bf16.msra.mxu0 %v3851_v26 }
  0xd7   : > { %3336 = vmatprep.subr.bf16.mxu0 %v3854_v32  ;;  %3185 = vmatpush3.bf16.msra.mxu1 %v3857_v37 }
  0xd8   : > { %3186 = vmatprep.subr.bf16.mxu1 %v3860_v40 }
  0xda   : > { %3337 = vmatpush3.bf16.msra.mxu0 %v3855_v33 }
  0xdb   : > { %3338 = vmatprep.subr.bf16.mxu0 %v3858_v38  ;;  %3187 = vmatpush3.bf16.msra.mxu1 %v3861_v42  ;;  %v3906_v42 = vld [vmem:[#allocation7 + $0x200] sm:$0xff]  }
  0xdd   : > { %3459 = vmatmul.mubr.bf16.gmra.mrb[12].mxu0 %v2955_v31  ;;  %v471_v31 = vld [vmem:[%s4450_s4 + $0x74] sm:$0xf] }
  0xde   : > { %3462 = vmatprep.mubr.msk.bf16.mxu0 %vm4151_vm0, %v4150_v0  ;;  %3339 = vmatpush3.bf16.msra.mxu0 %v3859_v39 }
  0xdf   : > { %3340 = vmatprep.subr.bf16.mxu0 %v3862_v43 }
  0xe5   : > { %3463 = vmatmul.mubr.bf16.gmra.mrb[16].mxu0 %v2956_v36  ;;  %v501_v36 = vmax.bf16 %v4152_v11, %v471_v31  ;;  %v3864_v11 = vld [vmem:[#allocation7 + $0x138] sm:$0xff]  }
  0xe6   : > { %3466 = vmatprep.mubr.msk.bf16.mxu0 %vm4151_vm0, %v4150_v0  ;;  %3188 = vmatprep.subr.bf16.mxu1 %v3864_v11 }
  0xe7   : > { %3189 = vmatpush3.bf16.msra.mxu1 %v3865_v45 }
  0xe8   : > { %3506 = vmatprep.subr.bf16.mxu1 %v4562_v53 }
  0xed   : > { %3467 = vmatmul.mubr.bf16.gmra.mrb[20].mxu0 %v2957_v41  ;;  %v2966_v41 = vcombine.low %v500_v35, %v501_v36 }
  0xee   : > { %3470 = vmatprep.mubr.msk.bf16.mxu0 %vm4151_vm0, %v4150_v0 }
  0xf5   : > { %3471 = vmatmul.mubr.bf16.gmra.mrb[24].mxu0 %v2958_v44  ;;  %v3863_v44 = vld [vmem:[#allocation7 + $0x198] sm:$0xff]  }
  0xf6   : > { %3474 = vmatprep.mubr.msk.bf16.mxu0 %vm4151_vm0, %v4150_v0  ;;  %3341 = vmatpush3.bf16.msra.mxu0 %v3863_v44 }
  0xfd   : > { %3475 = vmatmul.mubr.bf16.gmra.mrb[28].mxu0 %v2959_v49  ;;  %v3870_v49 = vld [vmem:[#allocation7 + $0x1f0] sm:$0xff]  }
  0xfe   : > { %3478 = vmatprep.mubr.msk.bf16.mxu0 %vm4151_vm0, %v4150_v0 }
 0x105   : > { %3479 = vmatmul.mubr.bf16.gmra.mrb[32].mxu0 %v2960_v54  ;;  %v4566_v54 = vstv %s2977_s23 }
 0x106   : > { %3482 = vmatprep.mubr.msk.bf16.mxu0 %vm4151_vm0, %v4150_v0  ;;  %v2978_v56 = vadd.s32 4294967295, %v4566_v54  ;;  %vm937_vm8 = vcmp.ge.s32.totalorder %v4566_v54, 0  ;;  %vm947_vm9 = vcmp.lt.s32.totalorder %v4566_v54, 16 }
 0x107   : > { %vm4619_vm10 = vmand %vm937_vm8, %vm947_vm9 }
 0x108   : > { %vm936_vm1 = vcmp.ge.s32.totalorder %v2978_v56, 0  ;;  %vm946_vm2 = vcmp.lt.s32.totalorder %v2978_v56, 16  ;;  %vm4630_vm13 = vmand %vm4619_vm10, %vm5438_vm4 }
 0x109   : > { %vm4583_vm3 = vmand %vm936_vm1, %vm946_vm2 }
 0x10a   : > { %vm4597_vm5 = vmand %vm4583_vm3, %vm5438_vm4 }
 0x10b   : > { %vm1004_vm7 = vmand %vm4583_vm3, %vm5435_vm6 }
 0x10c   : > { %vm1007_vm14 = vmand %vm4619_vm10, %vm5435_vm6 }
 0x10d   : > { %3483 = vmatmul.mubr.bf16.gmra.mrb[36].mxu0 %v2961_v59 }
 0x10e   : > { %3486 = vmatprep.mubr.msk.bf16.mxu0 %vm4151_vm0, %v4150_v0 }
 0x115   : > { %3487 = vmatmul.mubr.bf16.gmra.mrb[40].mxu0 %v2962_v1 }
 0x116   : > { %3490 = vmatprep.mubr.msk.bf16.mxu0 %vm4151_vm0, %v4150_v0 }
 0x11d   : > { %3491 = vmatmul.mubr.bf16.gmra.mrb[44].mxu0 %v2963_v7 }
 0x11e   : > { %3494 = vmatprep.mubr.msk.bf16.mxu0 %vm4151_vm0, %v4150_v0 }
 0x125   : > { %3495 = vmatmul.mubr.bf16.gmra.mrb[48].mxu0 %v2964_v17 }
 0x126   : > { %3498 = vmatprep.mubr.msk.bf16.mxu0 %vm4151_vm0, %v4150_v0 }
 0x12d   : > { %3499 = vmatmul.mubr.bf16.gmra.mrb[52].mxu0 %v2965_v28  ;;  %v915_v28 = vadd.s32 2, %v4566_v54 }
 0x12e   : > { %3502 = vmatprep.mubr.msk.bf16.mxu0 %vm4151_vm0, %v4150_v0  ;;  %v3866_v0 = vld [vmem:[#allocation7 + $0x1e0] sm:$0xff]  }
 0x12f   : > { %3342 = vmatprep.subr.bf16.mxu0 %v3866_v0  ;;  %v2979_v43 = vadd.s32 4294967295, %v915_v28 }
 0x130   : > { %3343 = vmatpush3.bf16.msra.mxu0 %v3867_v46 }
 0x131   : > { %3344 = vmatprep.subr.bf16.mxu0 %v3868_v47  ;;  %vm938_vm15 = vcmp.ge.s32.totalorder %v2979_v43, 0  ;;  %vm948_vm0 = vcmp.lt.s32.totalorder %v2979_v43, 16 }
 0x132   : > { %vm4653_vm1 = vmand %vm938_vm15, %vm948_vm0 }
 0x133   : > { %vm4663_vm2 = vmand %vm4653_vm1, %vm5438_vm4 }
 0x134   : > { %3345 = vmatpush3.bf16.msra.mxu0 %v3869_v48  ;;  %vm1010_vm8 = vmand %vm4653_vm1, %vm5435_vm6 }
 0x135   : > { %3503 = vmatmul.mubr.bf16.gmra.mrb[56].mxu0 %v2966_v41  ;;  %3346 = vmatprep.subr.bf16.mxu0 %v3870_v49 }
 0x138   : > { %3347 = vmatpush3.bf16.msra.mxu0 %v3871_v50 }
 0x139   : > { %3348 = vmatprep.subr.bf16.mxu0 %v3872_v51 }
 0x13c   : > { %3349 = vmatpush3.bf16.msra.mxu0 %v3873_v52 }
 0x198   : > { %v690_v59 = vpop.f32.mrb[0].mxu0 }
 0x199   : > { %v816_v61 = vmul.f32 %v4572_v57, %v690_v59  ;;  %v3448_v62 = vpop.f32.mrb[1].mxu0 }
 0x19a   : > { %v693_v63 = vpop.f32.mrb[2].mxu0 }
 0x19b   : > { %v853_v1 = vadd.f32 %v4579_v60, %v816_v61  ;;  %v817_v3 = vmul.f32 %v4572_v57, %v693_v63  ;;  %v3449_v4 = vpop.f32.mrb[3].mxu0 }
 0x19d   : > { %v883_v6 = vmax.f32 %v853_v1, 0.0  ;;  %v854_v7 = vadd.f32 %v4579_v60, %v817_v3 }
 0x19f   : > { %v884_v9 = vmax.f32 %v854_v7, 0.0  ;;  %v1092_v12 = vsel %vm4597_vm5, %v883_v6, 0.0 }
 0x1a0   : > { %v698_v10 = vpop.f32.mrb[4].mxu0 }
 0x1a1   : > { %v1093_v13 = vsel %vm4583_vm3, %v884_v9, 0.0  ;;  %v4606_v14 = vpack.c.bf16 %v884_v9, %v883_v6  ;;  %v818_v15 = vmul.f32 %v4572_v57, %v698_v10  ;;  %v3452_v16 = vpop.f32.mrb[5].mxu0 }
 0x1a2   : > { %v1122_v17 = vpack.c.bf16 %v1093_v13, %v1092_v12  ;;  %v701_v18 = vpop.f32.mrb[6].mxu0 }
 0x1a3   : > { %v855_v19 = vadd.f32 %v4579_v60, %v818_v15  ;;  %v819_v20 = vmul.f32 %v4572_v57, %v701_v18  ;;  %v3453_v21 = vpop.f32.mrb[7].mxu0 }
 0x1a4   : > { %v1146_v22 = vshll.u32 %v1122_v17, 16  ;;  %v1144_v34 = vshrl.u32 %v1122_v17, 16  ;;  %v1294_v36 = vrot.slane %v1122_v17, 1  ;;  %v916_v21 = vadd.s32 3, %v4566_v54 }
 0x1a5   : > { %v885_v23 = vmax.f32 %v855_v19, 0.0  ;;  %v856_v25 = vadd.f32 %v4579_v60, %v819_v20 }
 0x1a6   : > { %v1148_v29 = vrot.slane %v1146_v22, 1 }
 0x1a7   : > { %v1094_v24 = vsel %vm1004_vm7, %v885_v23, 0.0  ;;  %v886_v38 = vmax.f32 %v856_v25, 0.0  ;;  %vm5434_vm7 = vmpackc.low %vm4619_vm10, %vm4630_vm13 }
 0x1a8   : > { %v1123_v26 = vpack.c.bf16 %v1094_v24, %v1094_v24  ;;  %v706_v27 = vpop.f32.mrb[8].mxu0  ;;  %v1149_v44 = vor.u32 %v1148_v29, %v1144_v34 }
 0x1a9   : > { %v820_v31 = vmul.f32 %v4572_v57, %v706_v27  ;;  %v3456_v32 = vpop.f32.mrb[9].mxu0  ;;  %v1095_v48 = vsel %vm4630_vm13, %v886_v38, 0.0 }
 0x1aa   : > { %v709_v33 = vpop.f32.mrb[10].mxu0  ;;  %v1151_v35 = vshll.u32 %v1123_v26, 16  ;;  %v1295_v37 = vrot.slane %v1123_v26, 1  ;;  %v3875_v26 = vld [vmem:[#allocation7 + $0x148] sm:$0xff]  }
 0x1ab   : > { %v857_v39 = vadd.f32 %v4579_v60, %v820_v31  ;;  %v821_v40 = vmul.f32 %v4572_v57, %v709_v33  ;;  %v3457_v41 = vpop.f32.mrb[11].mxu0 }
 0x1ac   : > { %v1153_v11 = vrot.slane %v1151_v35, 1  ;;  %v4635_v45 = vsel %vm5437_vm11, %v1294_v36, %v1295_v37  ;;  %v2980_v35 = vadd.s32 4294967295, %v916_v21 }
 0x1ad   : > { %v887_v0 = vmax.f32 %v857_v39, 0.0  ;;  %v858_v46 = vadd.f32 %v4579_v60, %v821_v40  ;;  %v3876_v40 = vld [vmem:[#allocation7 + $0x150] sm:$0xff]  }
 0x1ae   : > { %v4643_v47 = vsel %vm5436_vm12, %v1149_v44, %v1153_v11  ;;  %vm939_vm9 = vcmp.ge.s32.totalorder %v2980_v35, 0 }
 0x1af   : > { %v1096_v49 = vsel %vm4619_vm10, %v887_v0, 0.0  ;;  %v4649_v50 = vpack.c.bf16 %v887_v0, %v886_v38  ;;  %v888_v51 = vmax.f32 %v858_v46, 0.0 }
 0x1b0   : > { %v1124_v52 = vpack.c.bf16 %v1096_v49, %v1095_v48  ;;  %v714_v55 = vpop.f32.mrb[12].mxu0  ;;  %v3877_v48 = vld [vmem:[#allocation7 + $0x158] sm:$0xff]  }
 0x1b1   : > { %v1097_v56 = vsel %vm1007_vm14, %v888_v51, 0.0  ;;  %v822_v59 = vmul.f32 %v4572_v57, %v714_v55  ;;  %v3460_v61 = vpop.f32.mrb[13].mxu0  ;;  %vm949_vm14 = vcmp.lt.s32.totalorder %v2980_v35, 16  ;;  %v3879_v35 = vld [vmem:[#allocation7 + $0x168] sm:$0xff]  }
 0x1b2   : > { %v1125_v62 = vpack.c.bf16 %v1097_v56, %v1097_v56  ;;  %v717_v63 = vpop.f32.mrb[14].mxu0  ;;  %v1158_v1 = vshll.u32 %v1124_v52, 16  ;;  %v1156_v9 = vshrl.u32 %v1124_v52, 16  ;;  %v1297_v13 = vrot.slane %v1124_v52, 1  ;;  %vm4701_vm15 = vmand %vm939_vm9, %vm949_vm14 }
 0x1b3   : > { %v859_v3 = vadd.f32 %v4579_v60, %v822_v59  ;;  %v823_v6 = vmul.f32 %v4572_v57, %v717_v63  ;;  %v3461_v7 = vpop.f32.mrb[15].mxu0  ;;  %vm4712_vm0 = vmand %vm4701_vm15, %vm5438_vm4 }
 0x1b4   : > { %v1160_v10 = vrot.slane %v1158_v1, 1  ;;  %v1163_v12 = vshll.u32 %v1125_v62, 16  ;;  %v1298_v15 = vrot.slane %v1125_v62, 1  ;;  %vm1013_vm9 = vmand %vm4701_vm15, %vm5435_vm6 }
 0x1b5   : > { %v889_v16 = vmax.f32 %v859_v3, 0.0  ;;  %v860_v17 = vadd.f32 %v4579_v60, %v823_v6 }
 0x1b6   : > { %v1161_v19 = vor.u32 %v1160_v10, %v1156_v9  ;;  %v1165_v20 = vrot.slane %v1163_v12, 1  ;;  %v4669_v22 = vsel %vm5437_vm11, %v1297_v13, %v1298_v15 }
 0x1b7   : > { %v890_v23 = vmax.f32 %v860_v17, 0.0  ;;  %v1098_v27 = vsel %vm4663_vm2, %v889_v16, 0.0  ;;  %v3910_v17 = vld [vmem:[#allocation7 + $0x220] sm:$0xff]  }
 0x1b8   : > { %v722_v24 = vpop.f32.mrb[16].mxu0  ;;  %v4676_v25 = vsel %vm5436_vm12, %v1161_v19, %v1165_v20  ;;  %v3878_v20 = vld [vmem:[#allocation7 + $0x160] sm:$0xff]  }
 0x1b9   : > { %v1099_v28 = vsel %vm4653_vm1, %v890_v23, 0.0  ;;  %v4682_v29 = vpack.c.bf16 %v890_v23, %v889_v16  ;;  %v824_v31 = vmul.f32 %v4572_v57, %v722_v24  ;;  %v3464_v32 = vpop.f32.mrb[17].mxu0  ;;  %1607 = vmatprep.mubr.bf16.mxu1 %v4676_v25 }
 0x1ba   : > { %v1126_v33 = vpack.c.bf16 %v1099_v28, %v1098_v27  ;;  %v725_v34 = vpop.f32.mrb[18].mxu0  ;;  %3013 = vmatmul.mubr.msk.bf16.vlgmr.msra.gmra.mrb[0].mxu1 %vm5434_vm7, %v4649_v50 }
 0x1bb   : > { %v861_v36 = vadd.f32 %v4579_v60, %v824_v31  ;;  %v825_v37 = vmul.f32 %v4572_v57, %v725_v34  ;;  %v3465_v38 = vpop.f32.mrb[19].mxu0  ;;  %3507 = vmatpush3.bf16.msra.mxu1 %v4562_v53  ;;  %v917_v53 = vadd.s32 4, %v4566_v54 }
 0x1bc   : > { %v1170_v39 = vshll.u32 %v1126_v33, 16  ;;  %3508 = vmatprep.subr.bf16.mxu1 %v3875_v26  ;;  %v1168_v59 = vshrl.u32 %v1126_v33, 16  ;;  %v1300_v62 = vrot.slane %v1126_v33, 1 }
 0x1bd   : > { %v891_v41 = vmax.f32 %v861_v36, 0.0  ;;  %v862_v44 = vadd.f32 %v4579_v60, %v825_v37  ;;  %v2981_v12 = vadd.s32 4294967295, %v917_v53 }
 0x1be   : > { %v1172_v46 = vrot.slane %v1170_v39, 1 }
 0x1bf   : > { %v1100_v43 = vsel %vm1010_vm8, %v891_v41, 0.0  ;;  %3509 = vmatpush3.bf16.msra.mxu1 %v3875_v26  ;;  %v892_v63 = vmax.f32 %v862_v44, 0.0  ;;  %vm4724_vm8 = vmpackc.low %vm4653_vm1, %vm4663_vm2  ;;  %vm940_vm1 = vcmp.ge.s32.totalorder %v2981_v12, 0  ;;  %vm950_vm2 = vcmp.lt.s32.totalorder %v2981_v12, 16 }
 0x1c0   : > { %v1127_v11 = vpack.c.bf16 %v1100_v43, %v1100_v43  ;;  %v730_v0 = vpop.f32.mrb[20].mxu0  ;;  %3510 = vmatprep.subr.bf16.mxu1 %v3876_v40  ;;  %v1173_v9 = vor.u32 %v1172_v46, %v1168_v59  ;;  %vm4751_vm14 = vmand %vm940_vm1, %vm950_vm2  ;;  %v3913_v59 = vld [vmem:[#allocation7 + $0x238] sm:$0xff]  }
 0x1c1   : > { %v826_v51 = vmul.f32 %v4572_v57, %v730_v0  ;;  %v3468_v52 = vpop.f32.mrb[21].mxu0  ;;  %v1101_v21 = vsel %vm4712_vm0, %v892_v63, 0.0  ;;  %vm4773_vm1 = vmpackc.low %vm4701_vm15, %vm4712_vm0 }
 0x1c2   : > { %v1301_v55 = vrot.slane %v1127_v11, 1  ;;  %v733_v56 = vpop.f32.mrb[22].mxu0  ;;  %v1175_v61 = vshll.u32 %v1127_v11, 16  ;;  %v918_v52 = vadd.s32 5, %v4566_v54 }
 0x1c3   : > { %v863_v1 = vadd.f32 %v4579_v60, %v826_v51  ;;  %v827_v3 = vmul.f32 %v4572_v57, %v733_v56  ;;  %v3469_v6 = vpop.f32.mrb[23].mxu0  ;;  %3511 = vmatpush3.bf16.msra.mxu1 %v3876_v40 }
 0x1c4   : > { %v1177_v10 = vrot.slane %v1175_v61, 1  ;;  %3512 = vmatprep.subr.bf16.mxu1 %v3877_v48  ;;  %v4717_v13 = vsel %vm5437_vm11, %v1300_v62, %v1301_v55  ;;  %v2982_v12 = vadd.s32 4294967295, %v918_v52 }
 0x1c5   : > { %v893_v15 = vmax.f32 %v863_v1, 0.0  ;;  %v864_v16 = vadd.f32 %v4579_v60, %v827_v3 }
 0x1c6   : > { %v4733_v19 = vsel %vm5436_vm12, %v1173_v9, %v1177_v10  ;;  %vm941_vm0 = vcmp.ge.s32.totalorder %v2982_v12, 0  ;;  %vm951_vm2 = vcmp.lt.s32.totalorder %v2982_v12, 16 }
 0x1c7   : > { %v1102_v18 = vsel %vm4701_vm15, %v893_v15, 0.0  ;;  %v4739_v4 = vpack.c.bf16 %v893_v15, %v892_v63  ;;  %v894_v23 = vmax.f32 %v864_v16, 0.0  ;;  %1615 = vmatprep.mubr.bf16.mxu1 %v4733_v19  ;;  %2332 = vmatprep.mubr.bf16.mxu0 %v4733_v19  ;;  %v3880_v63 = vld [vmem:[#allocation7 + $0x170] sm:$0xff]   ;;  %vm1016_vm15 = vmand %vm4751_vm14, %vm5435_vm6 }
 0x1c8   : > { %v1128_v24 = vpack.c.bf16 %v1102_v18, %v1101_v21  ;;  %v738_v26 = vpop.f32.mrb[24].mxu0  ;;  %3016 = vmatmul.mubr.msk.bf16.gmra.mrb[4].mxu1 %vm4724_vm8, %v4682_v29  ;;  %3109 = vmatmul.mubr.msk.bf16.vlgmr.msra.gmra.mrb[60].mxu0 %vm4724_vm8, %v4682_v29  ;;  %v3881_v18 = vld [vmem:[#allocation7 + $0x178] sm:$0xff]   ;;  %vm4803_vm7 = vmand %vm941_vm0, %vm951_vm2 }
 0x1c9   : > { %v1103_v27 = vsel %vm1013_vm9, %v894_v23, 0.0  ;;  %v828_v28 = vmul.f32 %v4572_v57, %v738_v26  ;;  %v3472_v31 = vpop.f32.mrb[25].mxu0  ;;  %3513 = vmatpush3.bf16.msra.mxu1 %v3877_v48  ;;  %vm4761_vm9 = vmand %vm4751_vm14, %vm5438_vm4 }
 0x1ca   : > { %v1129_v32 = vpack.c.bf16 %v1103_v27, %v1103_v27  ;;  %v741_v33 = vpop.f32.mrb[26].mxu0  ;;  %v1182_v34 = vshll.u32 %v1128_v24, 16  ;;  %3514 = vmatprep.subr.bf16.mxu1 %v3878_v20  ;;  %v1180_v40 = vshrl.u32 %v1128_v24, 16  ;;  %v1303_v44 = vrot.slane %v1128_v24, 1  ;;  %vm4826_vm0 = vmpackc.low %vm4751_vm14, %vm4761_vm9 }
 0x1cb   : > { %v865_v36 = vadd.f32 %v4579_v60, %v828_v28  ;;  %v829_v38 = vmul.f32 %v4572_v57, %v741_v33  ;;  %v3473_v39 = vpop.f32.mrb[27].mxu0  ;;  %v3882_v33 = vld [vmem:[#allocation7 + $0x40] sm:$0xff]   ;;  %vm1019_vm2 = vmand %vm4803_vm7, %vm5435_vm6 }
 0x1cc   : > { %v1184_v41 = vrot.slane %v1182_v34, 1  ;;  %v1187_v43 = vshll.u32 %v1129_v32, 16  ;;  %v1304_v11 = vrot.slane %v1129_v32, 1  ;;  %v919_v32 = vadd.s32 6, %v4566_v54 }
 0x1cd   : > { %v895_v0 = vmax.f32 %v865_v36, 0.0  ;;  %v866_v46 = vadd.f32 %v4579_v60, %v829_v38  ;;  %3515 = vmatpush3.bf16.msra.mxu1 %v3878_v20 }
 0x1ce   : > { %v1185_v48 = vor.u32 %v1184_v41, %v1180_v40  ;;  %v1189_v51 = vrot.slane %v1187_v43, 1  ;;  %3516 = vmatprep.subr.bf16.mxu1 %v3879_v35  ;;  %v4767_v55 = vsel %vm5437_vm11, %v1303_v44, %v1304_v11 }
 0x1cf   : > { %v896_v56 = vmax.f32 %v866_v46, 0.0  ;;  %v1104_v1 = vsel %vm4761_vm9, %v895_v0, 0.0 }
 0x1d0   : > { %v746_v61 = vpop.f32.mrb[28].mxu0  ;;  %v4778_v62 = vsel %vm5436_vm12, %v1185_v48, %v1189_v51 }
 0x1d1   : > { %v1105_v3 = vsel %vm4751_vm14, %v896_v56, 0.0  ;;  %v4784_v6 = vpack.c.bf16 %v896_v56, %v895_v0  ;;  %v830_v7 = vmul.f32 %v4572_v57, %v746_v61  ;;  %v3476_v49 = vpop.f32.mrb[29].mxu0  ;;  %1623 = vmatprep.mubr.bf16.mxu1 %v4778_v62  ;;  %2340 = vmatprep.mubr.bf16.mxu0 %v4778_v62  ;;  %v2983_v56 = vadd.s32 4294967295, %v919_v32 }
 0x1d2   : > { %v1130_v9 = vpack.c.bf16 %v1105_v3, %v1104_v1  ;;  %v749_v10 = vpop.f32.mrb[30].mxu0  ;;  %3019 = vmatmul.mubr.msk.bf16.gmra.mrb[8].mxu1 %vm4773_vm1, %v4739_v4  ;;  %3112 = vmatmul.mubr.msk.bf16.gmra.mrb[64].mxu0 %vm4773_vm1, %v4739_v4 }
 0x1d3   : > { %v867_v15 = vadd.f32 %v4579_v60, %v830_v7  ;;  %v831_v16 = vmul.f32 %v4572_v57, %v749_v10  ;;  %v3477_v20 = vpop.f32.mrb[31].mxu0  ;;  %3517 = vmatpush3.bf16.msra.mxu1 %v3879_v35  ;;  %vm942_vm14 = vcmp.ge.s32.totalorder %v2983_v56, 0  ;;  %vm952_vm9 = vcmp.lt.s32.totalorder %v2983_v56, 16 }
 0x1d4   : > { %v1194_v21 = vshll.u32 %v1130_v9, 16  ;;  %3518 = vmatprep.subr.bf16.mxu1 %v3880_v63  ;;  %v1192_v39 = vshrl.u32 %v1130_v9, 16  ;;  %v1306_v41 = vrot.slane %v1130_v9, 1  ;;  %vm4853_vm6 = vmand %vm942_vm14, %vm952_vm9 }
 0x1d5   : > { %v897_v23 = vmax.f32 %v867_v15, 0.0  ;;  %v868_v26 = vadd.f32 %v4579_v60, %v831_v16 }
 0x1d6   : > { %v1196_v31 = vrot.slane %v1194_v21, 1 }
 0x1d7   : > { %v1106_v24 = vsel %vm1016_vm15, %v897_v23, 0.0  ;;  %3519 = vmatpush3.bf16.msra.mxu1 %v3880_v63  ;;  %v898_v44 = vmax.f32 %v868_v26, 0.0  ;;  %vm4814_vm15 = vmand %vm4803_vm7, %vm5438_vm4 }
 0x1d8   : > { %v1131_v27 = vpack.c.bf16 %v1106_v24, %v1106_v24  ;;  %v754_v28 = vpop.f32.mrb[32].mxu0  ;;  %3520 = vmatprep.subr.bf16.mxu1 %v3881_v18  ;;  %v1197_v51 = vor.u32 %v1196_v31, %v1192_v39  ;;  %vm4875_vm14 = vmpackc.low %vm4803_vm7, %vm4814_vm15 }
 0x1d9   : > { %v832_v35 = vmul.f32 %v4572_v57, %v754_v28  ;;  %v3480_v36 = vpop.f32.mrb[33].mxu0  ;;  %v1107_v49 = vsel %vm4814_vm15, %v898_v44, 0.0 }
 0x1da   : > { %v757_v38 = vpop.f32.mrb[34].mxu0  ;;  %v1199_v40 = vshll.u32 %v1131_v27, 16  ;;  %v1307_v43 = vrot.slane %v1131_v27, 1 }
 0x1db   : > { %v869_v11 = vadd.f32 %v4579_v60, %v832_v35  ;;  %v833_v0 = vmul.f32 %v4572_v57, %v757_v38  ;;  %v3481_v46 = vpop.f32.mrb[35].mxu0  ;;  %3521 = vmatpush3.bf16.msra.mxu1 %v3881_v18 }
 0x1dc   : > { %v1201_v52 = vrot.slane %v1199_v40, 1  ;;  %3254 = vmatprep.subr.bf16.mxu1 %v3882_v33  ;;  %v4819_v61 = vsel %vm5437_vm11, %v1306_v41, %v1307_v43  ;;  %v5505_v46 = vmov 0 }
 0x1dd   : > { %v899_v63 = vmax.f32 %v869_v11, 0.0  ;;  %v870_v1 = vadd.f32 %v4579_v60, %v833_v0  ;;  %v5506_v46 = vsel %vm4875_vm14, 4294967295, %v5505_v46 }
 0x1de   : > { %v4835_v7 = vsel %vm5436_vm12, %v1197_v51, %v1201_v52 }
 0x1df   : > { %v1108_v53 = vsel %vm4803_vm7, %v899_v63, 0.0  ;;  %v4841_v9 = vpack.c.bf16 %v899_v63, %v898_v44  ;;  %v900_v37 = vmax.f32 %v870_v1, 0.0  ;;  %1631 = vmatprep.mubr.bf16.mxu1 %v4835_v7  ;;  %2348 = vmatprep.mubr.bf16.mxu0 %v4835_v7  ;;  %v920_v44 = vadd.s32 7, %v4566_v54 }
 0x1e0   : > { %v1132_v10 = vpack.c.bf16 %v1108_v53, %v1107_v49  ;;  %v762_v12 = vpop.f32.mrb[36].mxu0  ;;  %3022 = vmatmul.mubr.msk.bf16.gmra.mrb[12].mxu1 %vm4826_vm0, %v4784_v6  ;;  %3115 = vmatmul.mubr.msk.bf16.gmra.mrb[68].mxu0 %vm4826_vm0, %v4784_v6  ;;  %vm5507_vm7 = vcmp.le.s32.totalorder %v4590_v5, 16 }
 0x1e1   : > { %v1109_v15 = vsel %vm1019_vm2, %v900_v37, 0.0  ;;  %v834_v16 = vmul.f32 %v4572_v57, %v762_v12  ;;  %v3484_v20 = vpop.f32.mrb[37].mxu0  ;;  %vm4863_vm2 = vmand %vm4853_vm6, %vm5438_vm4  ;;  %v2984_v37 = vadd.s32 4294967295, %v920_v44 }
 0x1e2   : > { %v1133_v21 = vpack.c.bf16 %v1109_v15, %v1109_v15  ;;  %v765_v18 = vpop.f32.mrb[38].mxu0  ;;  %v1206_v23 = vshll.u32 %v1132_v10, 16  ;;  %v1204_v31 = vshrl.u32 %v1132_v10, 16  ;;  %v1309_v35 = vrot.slane %v1132_v10, 1  ;;  %vm1022_vm15 = vmand %vm4853_vm6, %vm5507_vm7 }
 0x1e3   : > { %v871_v24 = vadd.f32 %v4579_v60, %v834_v16  ;;  %v835_v27 = vmul.f32 %v4572_v57, %v765_v18  ;;  %v3485_v28 = vpop.f32.mrb[39].mxu0  ;;  %vm943_vm9 = vcmp.ge.s32.totalorder %v2984_v37, 0  ;;  %vm5512_vm7 = vcmask 1046528  }
 0x1e4   : > { %v1208_v32 = vrot.slane %v1206_v23, 1  ;;  %v1211_v33 = vshll.u32 %v1133_v21, 16  ;;  %v1310_v36 = vrot.slane %v1133_v21, 1  ;;  %v921_v28 = vadd.s32 8, %v4566_v54 }
 0x1e5   : > { %v901_v38 = vmax.f32 %v871_v24, 0.0  ;;  %v872_v39 = vadd.f32 %v4579_v60, %v835_v27 }
 0x1e6   : > { %v1209_v41 = vor.u32 %v1208_v32, %v1204_v31  ;;  %v1213_v43 = vrot.slane %v1211_v33, 1  ;;  %v4869_v11 = vsel %vm5437_vm11, %v1309_v35, %v1310_v36 }
 0x1e7   : > { %v902_v0 = vmax.f32 %v872_v39, 0.0  ;;  %v1110_v56 = vsel %vm4863_vm2, %v901_v38, 0.0 }
 0x1e8   : > { %v770_v51 = vpop.f32.mrb[40].mxu0  ;;  %v4880_v52 = vsel %vm5436_vm12, %v1209_v41, %v1213_v43  ;;  %vm953_vm12 = vcmp.lt.s32.totalorder %v2984_v37, 16 }
 0x1e9   : > { %v1111_v63 = vsel %vm4853_vm6, %v902_v0, 0.0  ;;  %v4886_v1 = vpack.c.bf16 %v902_v0, %v901_v38  ;;  %v836_v48 = vmul.f32 %v4572_v57, %v770_v51  ;;  %v3488_v49 = vpop.f32.mrb[41].mxu0  ;;  %1639 = vmatprep.mubr.bf16.mxu1 %v4880_v52  ;;  %2356 = vmatprep.mubr.bf16.mxu0 %v4880_v52  ;;  %vm4905_vm11 = vmand %vm943_vm9, %vm953_vm12  ;;  %vm5515_vm9 = vcmp.le.s32.totalorder %v4590_v5, 16 }
 0x1ea   : > { %v1134_v34 = vpack.c.bf16 %v1111_v63, %v1110_v56  ;;  %v773_v53 = vpop.f32.mrb[42].mxu0  ;;  %3025 = vmatmul.mubr.msk.bf16.gmra.mrb[16].mxu1 %vm4875_vm14, %v4841_v9  ;;  %3118 = vmatmul.mubr.msk.bf16.gmra.mrb[72].mxu0 %vm4875_vm14, %v4841_v9  ;;  %vm4916_vm12 = vmand %vm4905_vm11, %vm5438_vm4  ;;  %v2985_v49 = vadd.s32 4294967295, %v921_v28  ;;  %vm5516_vm14 = vsmask.f32 7424 }
 0x1eb   : > { %v873_v10 = vadd.f32 %v4579_v60, %v836_v48  ;;  %v837_v12 = vmul.f32 %v4572_v57, %v773_v53  ;;  %v3489_v15 = vpop.f32.mrb[43].mxu0  ;;  %vm1025_vm4 = vmand %vm4905_vm11, %vm5515_vm9  ;;  %vm5522_vm9 = vcmask 1046528  }
 0x1ec   : > { %v1218_v16 = vshll.u32 %v1134_v34, 16  ;;  %v1216_v36 = vshrl.u32 %v1134_v34, 16  ;;  %v1312_v39 = vrot.slane %v1134_v34, 1 }
 0x1ed   : > { %v903_v20 = vmax.f32 %v873_v10, 0.0  ;;  %v874_v18 = vadd.f32 %v4579_v60, %v837_v12  ;;  %v5513_v10 = vmov 0 }
 0x1ee   : > { %v1220_v27 = vrot.slane %v1218_v16, 1 }
 0x1ef   : > { %v1112_v21 = vsel %vm1022_vm15, %v903_v20, 0.0  ;;  %v904_v43 = vmax.f32 %v874_v18, 0.0  ;;  %vm4928_vm15 = vmpackc.low %vm4853_vm6, %vm4863_vm2  ;;  %vm944_vm6 = vcmp.ge.s32.totalorder %v2985_v49, 0  ;;  %vm954_vm2 = vcmp.lt.s32.totalorder %v2985_v49, 16 }
 0x1f0   : > { %v1135_v23 = vpack.c.bf16 %v1112_v21, %v1112_v21  ;;  %v778_v24 = vpop.f32.mrb[44].mxu0  ;;  %v1221_v63 = vor.u32 %v1220_v27, %v1216_v36  ;;  %v5514_v10 = vsel %vm4928_vm15, 4294967295, %v5513_v10 }
 0x1f1   : > { %v838_v32 = vmul.f32 %v4572_v57, %v778_v24  ;;  %v3492_v33 = vpop.f32.mrb[45].mxu0  ;;  %v1113_v15 = vsel %vm4916_vm12, %v904_v43, 0.0 }
 0x1f2   : > { %v781_v35 = vpop.f32.mrb[46].mxu0  ;;  %v1223_v38 = vshll.u32 %v1135_v23, 16  ;;  %v1313_v41 = vrot.slane %v1135_v23, 1 }
 0x1f3   : > { %v875_v44 = vadd.f32 %v4579_v60, %v838_v32  ;;  %v839_v0 = vmul.f32 %v4572_v57, %v781_v35  ;;  %v3493_v51 = vpop.f32.mrb[47].mxu0 }
 0x1f4   : > { %v1225_v48 = vrot.slane %v1223_v38, 1  ;;  %v4921_v34 = vsel %vm5512_vm7, %v1312_v39, %v1313_v41 }
 0x1f5   : > { %v905_v53 = vmax.f32 %v875_v44, 0.0  ;;  %v876_v37 = vadd.f32 %v4579_v60, %v839_v0 }
 0x1f6   : > { %v4937_v12 = vsel %vm5516_vm14, %v1221_v63, %v1225_v48  ;;  %vm4955_vm14 = vmand %vm944_vm6, %vm954_vm2  ;;  %vm5525_vm2 = vsmask.f32 7424 }
 0x1f7   : > { %v1114_v40 = vsel %vm4905_vm11, %v905_v53, 0.0  ;;  %v4943_v16 = vpack.c.bf16 %v905_v53, %v904_v43  ;;  %v906_v26 = vmax.f32 %v876_v37, 0.0  ;;  %1647 = vmatprep.mubr.bf16.mxu1 %v4937_v12  ;;  %2364 = vmatprep.mubr.bf16.mxu0 %v4937_v12  ;;  %v922_v37 = vadd.s32 9, %v4566_v54  ;;  %vm4977_vm6 = vmpackc.low %vm4905_vm11, %vm4916_vm12 }
 0x1f8   : > { %v1136_v20 = vpack.c.bf16 %v1114_v40, %v1113_v15  ;;  %v786_v21 = vpop.f32.mrb[48].mxu0  ;;  %3028 = vmatmul.mubr.msk.bf16.gmra.mrb[20].mxu1 %vm4928_vm15, %v4886_v1  ;;  %3121 = vmatmul.mubr.msk.bf16.gmra.mrb[76].mxu0 %vm4928_vm15, %v4886_v1  ;;  %vm5526_vm11 = vcmp.le.s32.totalorder %v4590_v5, 16  ;;  %vm5534_vm15 = vsmask.f32 7424 }
 0x1f9   : > { %v1115_v18 = vsel %vm1025_vm4, %v906_v26, 0.0  ;;  %v840_v23 = vmul.f32 %v4572_v57, %v786_v21  ;;  %v3496_v24 = vpop.f32.mrb[49].mxu0  ;;  %vm5519_vm4 = vcmp.ge.s32.totalorder %v4574_v58, 1  ;;  %v5523_v26 = vmov 0  ;;  %vm1028_vm12 = vmand %vm4955_vm14, %vm5526_vm11 }
 0x1fa   : > { %v1137_v27 = vpack.c.bf16 %v1115_v18, %v1115_v18  ;;  %v789_v28 = vpop.f32.mrb[50].mxu0  ;;  %v1230_v32 = vshll.u32 %v1136_v20, 16  ;;  %v1228_v39 = vshrl.u32 %v1136_v20, 16  ;;  %v1315_v44 = vrot.slane %v1136_v20, 1  ;;  %vm4965_vm7 = vmand %vm4955_vm14, %vm5519_vm4 }
 0x1fb   : > { %v877_v33 = vadd.f32 %v4579_v60, %v840_v23  ;;  %v841_v36 = vmul.f32 %v4572_v57, %v789_v28  ;;  %v3497_v38 = vpop.f32.mrb[51].mxu0  ;;  %v5524_v26 = vsel %vm4977_vm6, 4294967295, %v5523_v26  ;;  %v2986_v28 = vadd.s32 4294967295, %v922_v37 }
 0x1fc   : > { %v1232_v41 = vrot.slane %v1230_v32, 1  ;;  %v1235_v43 = vshll.u32 %v1137_v27, 16  ;;  %v1316_v0 = vrot.slane %v1137_v27, 1  ;;  %vm5529_vm11 = vcmp.ge.s32.totalorder %v4574_v58, 1 }
 0x1fd   : > { %v907_v51 = vmax.f32 %v877_v33, 0.0  ;;  %v878_v63 = vadd.f32 %v4579_v60, %v841_v36  ;;  %vm945_vm4 = vcmp.ge.s32.totalorder %v2986_v28, 0 }
 0x1fe   : > { %v1233_v49 = vor.u32 %v1232_v41, %v1228_v39  ;;  %v1237_v53 = vrot.slane %v1235_v43, 1  ;;  %v4971_v15 = vsel %vm5522_vm9, %v1315_v44, %v1316_v0  ;;  %vm955_vm9 = vcmp.lt.s32.totalorder %v2986_v28, 16 }
 0x1ff   : > { %v908_v40 = vmax.f32 %v878_v63, 0.0  ;;  %v1116_v18 = vsel %vm4965_vm7, %v907_v51, 0.0  ;;  %v3890_v63 = vld [vmem:[#allocation7 + $0x60] sm:$0xff]  }
 0x200   : > { %v794_v20 = vpop.f32.mrb[52].mxu0  ;;  %v4982_v21 = vsel %vm5525_vm2, %v1233_v49, %v1237_v53  ;;  %vm5004_vm2 = vmand %vm945_vm4, %vm955_vm9  ;;  %vm5532_vm4 = vcmask 1046528  }
 0x201   : > { %v1117_v54 = vsel %vm4955_vm14, %v908_v40, 0.0  ;;  %v3033_v23 = vpack.c.bf16 %v908_v40, %v907_v51  ;;  %v842_v24 = vmul.f32 %v4572_v57, %v794_v20  ;;  %v3500_v56 = vpop.f32.mrb[53].mxu0  ;;  %1655 = vmatprep.mubr.bf16.mxu1 %v4982_v21  ;;  %2372 = vmatprep.mubr.bf16.mxu0 %v4982_v21  ;;  %vm3032_vm9 = vmpackc.low %vm4955_vm14, %vm4965_vm7  ;;  %vm5536_vm14 = vsmask.f32 7424 }
 0x202   : > { %v1138_v31 = vpack.c.bf16 %v1117_v54, %v1116_v18  ;;  %v797_v27 = vpop.f32.mrb[54].mxu0  ;;  %3031 = vmatmul.mubr.msk.bf16.gmra.mrb[24].mxu1 %vm4977_vm6, %v4943_v16  ;;  %3124 = vmatmul.mubr.msk.bf16.gmra.mrb[80].mxu0 %vm4977_vm6, %v4943_v16  ;;  %vm5533_vm6 = vcmp.le.s32.totalorder %v4590_v5, 16 }
 0x203   : > { %v879_v32 = vadd.f32 %v4579_v60, %v842_v24  ;;  %v843_v33 = vmul.f32 %v4572_v57, %v797_v27  ;;  %v3501_v36 = vpop.f32.mrb[55].mxu0 }
 0x204   : > { %v1242_v38 = vshll.u32 %v1138_v31, 16  ;;  %v1240_v40 = vshrl.u32 %v1138_v31, 16  ;;  %v1318_v18 = vrot.slane %v1138_v31, 1 }
 0x205   : > { %v909_v39 = vmax.f32 %v879_v32, 0.0  ;;  %v880_v43 = vadd.f32 %v4579_v60, %v843_v33  ;;  %v3889_v32 = vld [vmem:[#allocation7 + $0x18] sm:$0xff]  }
 0x206   : > { %v1244_v51 = vrot.slane %v1242_v38, 1 }
 0x207   : > { %v1118_v41 = vsel %vm1028_vm12, %v909_v39, 0.0  ;;  %v910_v24 = vmax.f32 %v880_v43, 0.0  ;;  %vm5015_vm12 = vmand %vm5004_vm2, %vm5529_vm11 }
 0x208   : > { %v1139_v44 = vpack.c.bf16 %v1118_v41, %v1118_v41  ;;  %v802_v0 = vpop.f32.mrb[56].mxu0  ;;  %v1245_v33 = vor.u32 %v1244_v51, %v1240_v40  ;;  %vm1031_vm11 = vmand %vm5004_vm2, %vm5533_vm6  ;;  %v3883_v40 = vld [vmem:[#allocation7] sm:$0xff]  }
 0x209   : > { %v844_v49 = vmul.f32 %v4572_v57, %v802_v0  ;;  %v3504_v53 = vpop.f32.mrb[57].mxu0  ;;  %v1119_v58 = vsel %vm5015_vm12, %v910_v24, 0.0  ;;  %vm3128_vm7 = vmpackc.low %vm5004_vm2, %vm5015_vm12 }
 0x20a   : > { %v805_v37 = vpop.f32.mrb[58].mxu0  ;;  %v1247_v20 = vshll.u32 %v1139_v44, 16  ;;  %v1319_v54 = vrot.slane %v1139_v44, 1  ;;  %vm3059_vm6 = vmpackc.low %vm4583_vm3, %vm4597_vm5  ;;  %vm5538_vm3 = vnez %v5506_v46  ;;  %vm5539_vm5 = vnez %v5514_v10 }
 0x20b   : > { %v881_v56 = vadd.f32 %v4579_v60, %v844_v49  ;;  %v845_v27 = vmul.f32 %v4572_v57, %v805_v37  ;;  %v3505_v28 = vpop.f32.mrb[59].mxu0 }
 0x20c   : > { %v1249_v36 = vrot.slane %v1247_v20, 1  ;;  %v5020_v38 = vsel %vm5532_vm4, %v1318_v18, %v1319_v54  ;;  %v3884_v54 = vld [vmem:[#allocation7 + $0x48] sm:$0xff]   ;;  %v3887_v28 = vld [vmem:[#allocation7 + $0x10] sm:$0xff]  }
 0x20d   : > { %v911_v31 = vmax.f32 %v881_v56, 0.0  ;;  %v882_v39 = vadd.f32 %v4579_v60, %v845_v27  ;;  %v3885_v56 = vld [vmem:[#allocation7 + $0x8] sm:$0xff]   ;;  %v3886_v27 = vld [vmem:[#allocation7 + $0x50] sm:$0xff]  }
 0x20e   : > { %v1250_v57 = vsel %vm5534_vm15, %v1245_v33, %v1249_v36  ;;  %vm5535_vm15 = vmmov %vm5532_vm4  ;;  %v3888_v33 = vld [vmem:[#allocation7 + $0x58] sm:$0xff]   ;;  %v3891_v36 = vld [vmem:[#allocation7 + $0x20] sm:$0xff]  }
 0x20f   : > { %v1120_v41 = vsel %vm5004_vm2, %v911_v31, 0.0  ;;  %v3129_v43 = vpack.c.bf16 %v911_v31, %v910_v24  ;;  %v912_v60 = vmax.f32 %v882_v39, 0.0  ;;  %1663 = vmatprep.mubr.bf16.mxu1 %v1250_v57  ;;  %2380 = vmatprep.mubr.bf16.mxu0 %v1250_v57  ;;  %v3892_v31 = vld [vmem:[#allocation7 + $0x68] sm:$0xff]   ;;  %v3894_v57 = vld [vmem:[#allocation7 + $0x70] sm:$0xff]   ;;  %vm5537_vm2 = vmpackc.low %vm4619_vm10, %vm4630_vm13  ;;  %vm5540_vm10 = vnez %v5524_v26 }
 0x210   : > { %v1140_v48 = vpack.c.bf16 %v1120_v41, %v1119_v58  ;;  %3034 = vmatmul.mubr.msk.bf16.gmra.mrb[28].mxu1 %vm3032_vm9, %v3033_v23  ;;  %3127 = vmatmul.mubr.msk.bf16.gmra.mrb[84].mxu0 %vm3032_vm9, %v3033_v23  ;;  %v3893_v39 = vld [vmem:[#allocation7 + $0x28] sm:$0xff]   ;;  %v3895_v58 = vld [vmem:[#allocation7 + $0x30] sm:$0xff]   ;;  %v3896_v41 = vld [vmem:[#allocation7 + $0x78] sm:$0xff]  }
 0x211   : > { %v1121_v35 = vsel %vm1031_vm11, %v912_v60, 0.0  ;;  %3522 = vmatprep.mubr.bf16.mxu1 %v4669_v22  ;;  %v3898_v60 = vld [vmem:[#allocation7 + $0x80] sm:$0xff]  }
 0x212   : > { %v1141_v5 = vpack.c.bf16 %v1121_v35, %v1121_v35  ;;  %v1254_v44 = vshll.u32 %v1140_v48, 16  ;;  %v1252_v0 = vshrl.u32 %v1140_v48, 16  ;;  %v1321_v53 = vrot.slane %v1140_v48, 1  ;;  %v3899_v48 = vld [vmem:[#allocation7 + $0x88] sm:$0xff]   ;;  %v3900_v35 = vld [vmem:[#allocation7 + $0x90] sm:$0xff]  }
 0x214   : > { %v1256_v51 = vrot.slane %v1254_v44, 1  ;;  %v1259_v49 = vshll.u32 %v1141_v5, 16  ;;  %v1322_v37 = vrot.slane %v1141_v5, 1 }
 0x216   : > { %v1257_v20 = vor.u32 %v1256_v51, %v1252_v0  ;;  %v1261_v18 = vrot.slane %v1259_v49, 1  ;;  %v5038_v24 = vsel %vm5535_vm15, %v1321_v53, %v1322_v37 }
 0x218   : > { %3523 = vmatmul.mubr.bf16.vlgmr.msra.gmra.mrb[32].mxu1 %v4717_v13  ;;  %v1262_v23 = vsel %vm5536_vm14, %v1257_v20, %v1261_v18 }
 0x219   : > { %3255 = vmatpush3.bf16.msra.mxu1 %v3883_v40  ;;  %3526 = vmatprep.mubr.bf16.mxu1 %v4767_v55 }
 0x21a   : > { %2388 = vmatprep.mubr.bf16.mxu0 %v1262_v23  ;;  %3256 = vmatprep.subr.bf16.mxu1 %v3884_v54 }
 0x21b   : > { %3130 = vmatmul.mubr.msk.bf16.gmra.mrb[88].mxu0 %vm3128_vm7, %v3129_v43  ;;  %v3897_v43 = vld [vmem:[#allocation7 + $0x38] sm:$0xff]  }
 0x21d   : > { %3257 = vmatpush3.bf16.msra.mxu1 %v3885_v56 }
 0x21e   : > { %3258 = vmatprep.subr.bf16.mxu1 %v3886_v27 }
 0x220   : > { %3527 = vmatmul.mubr.bf16.gmra.mrb[36].mxu1 %v4819_v61 }
 0x221   : > { %3259 = vmatpush3.bf16.msra.mxu1 %v3887_v28  ;;  %3530 = vmatprep.mubr.bf16.mxu1 %v4869_v11 }
 0x222   : > { %3260 = vmatprep.subr.bf16.mxu1 %v3888_v33 }
 0x225   : > { %3261 = vmatpush3.bf16.msra.mxu1 %v3889_v32 }
 0x226   : > { %3262 = vmatprep.subr.bf16.mxu1 %v3890_v63 }
 0x228   : > { %3531 = vmatmul.mubr.bf16.gmra.mrb[40].mxu1 %v4921_v34 }
 0x229   : > { %3263 = vmatpush3.bf16.msra.mxu1 %v3891_v36  ;;  %3534 = vmatprep.mubr.bf16.mxu1 %v4971_v15 }
 0x22a   : > { %3264 = vmatprep.subr.bf16.mxu1 %v3892_v31 }
 0x22d   : > { %3265 = vmatpush3.bf16.msra.mxu1 %v3893_v39 }
 0x22e   : > { %3266 = vmatprep.subr.bf16.mxu1 %v3894_v57  ;;  %v3914_v57 = vld [vmem:[#allocation8] sm:$0xff]  }
 0x22f   : > { %3602 = vmatprep.subr.bf16.mxu0 %v3914_v57 }
 0x230   : > { %3535 = vmatmul.mubr.bf16.gmra.mrb[44].mxu1 %v5020_v38  ;;  %3603 = vmatpush3.bf16.msra.mxu0 %v3914_v57 }
 0x231   : > { %3267 = vmatpush3.bf16.msra.mxu1 %v3895_v58  ;;  %1945 = vmatprep.mubr.bf16.mxu1 %v4643_v47  ;;  %v3901_v47 = vld [vmem:[#allocation7 + $0x98] sm:$0xff]  }
 0x232   : > { %3268 = vmatprep.subr.bf16.mxu1 %v3896_v41 }
 0x235   : > { %3269 = vmatpush3.bf16.msra.mxu1 %v3897_v43 }
 0x236   : > { %3538 = vmatprep.subr.bf16.mxu1 %v3898_v60 }
 0x238   : > { %3061 = vmatmul.mubr.msk.bf16.vlgmr.msra.gmra.mrb[48].mxu1 %vm3059_vm6, %v4606_v14  ;;  %v3904_v14 = vld [vmem:[#allocation7 + $0xb0] sm:$0xff]  }
 0x239   : > { %3539 = vmatpush3.bf16.msra.mxu1 %v3898_v60  ;;  %1953 = vmatprep.mubr.bf16.mxu1 %v4676_v25  ;;  %v3908_v25 = vld [vmem:[#allocation7 + $0x210] sm:$0xff]  }
 0x23a   : > { %3540 = vmatprep.subr.bf16.mxu1 %v3899_v48 }
 0x23d   : > { %3541 = vmatpush3.bf16.msra.mxu1 %v3899_v48 }
 0x23e   : > { %3542 = vmatprep.subr.bf16.mxu1 %v3900_v35 }
 0x240   : > { %3064 = vmatmul.mubr.msk.bf16.gmra.mrb[52].mxu1 %vm5537_vm2, %v4649_v50  ;;  %v3907_v50 = vld [vmem:[#allocation7 + $0x208] sm:$0xff]  }
 0x241   : > { %1961 = vmatprep.mubr.bf16.mxu1 %v4733_v19  ;;  %3543 = vmatpush3.bf16.msra.mxu1 %v3900_v35 }
 0x242   : > { %3544 = vmatprep.subr.bf16.mxu1 %v3901_v47 }
 0x245   : > { %3545 = vmatpush3.bf16.msra.mxu1 %v3901_v47 }
 0x246   : > { %3546 = vmatprep.subr.bf16.mxu1 %v3902_v2 }
 0x248   : > { %3067 = vmatmul.mubr.msk.bf16.gmra.mrb[56].mxu1 %vm4724_vm8, %v4682_v29  ;;  %v3909_v29 = vld [vmem:[#allocation7 + $0x218] sm:$0xff]  }
 0x249   : > { %1969 = vmatprep.mubr.bf16.mxu1 %v4778_v62  ;;  %3547 = vmatpush3.bf16.msra.mxu1 %v3902_v2 }
 0x24a   : > { %3548 = vmatprep.subr.bf16.mxu1 %v3903_v8 }
 0x24d   : > { %3549 = vmatpush3.bf16.msra.mxu1 %v3903_v8 }
 0x24e   : > { %3550 = vmatprep.subr.bf16.mxu1 %v3904_v14 }
 0x250   : > { %3070 = vmatmul.mubr.msk.bf16.gmra.mrb[60].mxu1 %vm4773_vm1, %v4739_v4 }
 0x251   : > { %1977 = vmatprep.mubr.bf16.mxu1 %v4835_v7  ;;  %3551 = vmatpush3.bf16.msra.mxu1 %v3904_v14 }
 0x252   : > { %3552 = vmatprep.subr.bf16.mxu1 %v3905_v30 }
 0x255   : > { %3553 = vmatpush3.bf16.msra.mxu1 %v3905_v30  ;;  %v3915_v30 = vld [vmem:[#allocation8 + $0x8] sm:$0xff]  }
 0x256   : > { %3570 = vmatprep.subr.bf16.mxu1 %v3906_v42  ;;  %3604 = vmatprep.subr.bf16.mxu0 %v3915_v30 }
 0x257   : > { %3605 = vmatpush3.bf16.msra.mxu0 %v3915_v30 }
 0x258   : > { %3073 = vmatmul.mubr.msk.bf16.gmra.mrb[64].mxu1 %vm4826_vm0, %v4784_v6 }
 0x259   : > { %1985 = vmatprep.mubr.bf16.mxu1 %v4880_v52 }
 0x260   : > { %3076 = vmatmul.mubr.msk.bf16.gmra.mrb[68].mxu1 %vm5538_vm3, %v4841_v9 }
 0x261   : > { %1993 = vmatprep.mubr.bf16.mxu1 %v4937_v12 }
 0x268   : > { %3079 = vmatmul.mubr.msk.bf16.gmra.mrb[72].mxu1 %vm5539_vm5, %v4886_v1 }
 0x269   : > { %2001 = vmatprep.mubr.bf16.mxu1 %v4982_v21 }
 0x270   : > { %3082 = vmatmul.mubr.msk.bf16.gmra.mrb[76].mxu1 %vm5540_vm10, %v4943_v16 }
 0x271   : > { %3554 = vmatprep.mubr.bf16.mxu1 %v4635_v45  ;;  %v3911_v45 = vld [vmem:[#allocation7 + $0x228] sm:$0xff]  }
 0x278   : > { %3555 = vmatmul.mubr.bf16.vlgmr.msra.gmra.mrb[32].mxu1 %v4669_v22  ;;  %v3912_v22 = vld [vmem:[#allocation7 + $0x230] sm:$0xff]  }
 0x279   : > { %3571 = vmatpush3.bf16.msra.mxu1 %v3906_v42  ;;  %3558 = vmatprep.mubr.bf16.mxu1 %v4717_v13  ;;  %v3916_v42 = vld [vmem:[#allocation8 + $0x10] sm:$0xff]  }
 0x27a   : > { %3572 = vmatprep.subr.bf16.mxu1 %v3907_v50  ;;  %3606 = vmatprep.subr.bf16.mxu0 %v3916_v42 }
 0x27b   : > { %3607 = vmatpush3.bf16.msra.mxu0 %v3916_v42 }
 0x27d   : > { %3573 = vmatpush3.bf16.msra.mxu1 %v3907_v50  ;;  %v3917_v50 = vld [vmem:[#allocation8 + $0x18] sm:$0xff]  }
 0x27e   : > { %3574 = vmatprep.subr.bf16.mxu1 %v3908_v25  ;;  %3608 = vmatprep.subr.bf16.mxu0 %v3917_v50 }
 0x27f   : > { %3609 = vmatpush3.bf16.msra.mxu0 %v3917_v50  ;;  %v3921_v50 = vld [vmem:[#allocation8 + $0x38] sm:$0xff]  }
 0x280   : > { %3559 = vmatmul.mubr.bf16.gmra.mrb[36].mxu1 %v4767_v55 }
 0x281   : > { %3575 = vmatpush3.bf16.msra.mxu1 %v3908_v25  ;;  %3562 = vmatprep.mubr.bf16.mxu1 %v4819_v61 }
 0x282   : > { %3576 = vmatprep.subr.bf16.mxu1 %v3909_v29 }
 0x285   : > { %3577 = vmatpush3.bf16.msra.mxu1 %v3909_v29 }
 0x286   : > { %3578 = vmatprep.subr.bf16.mxu1 %v3910_v17 }
 0x288   : > { %3563 = vmatmul.mubr.bf16.gmra.mrb[40].mxu1 %v4869_v11 }
 0x289   : > { %3579 = vmatpush3.bf16.msra.mxu1 %v3910_v17  ;;  %3566 = vmatprep.mubr.bf16.mxu1 %v4921_v34 }
 0x28a   : > { %3580 = vmatprep.subr.bf16.mxu1 %v3911_v45 }
 0x28d   : > { %3581 = vmatpush3.bf16.msra.mxu1 %v3911_v45  ;;  %v3190_v19 = vpop.f32.mrb[0].mxu1 }
 0x28e   : > { %v3191_v4 = vpop.f32.mrb[1].mxu1  ;;  %3582 = vmatprep.subr.bf16.mxu1 %v3912_v22 }
 0x28f   : > { %v5096_v62 = vadd.f32 %v3191_v4, %v3190_v19  ;;  %v3193_v6 = vpop.f32.mrb[2].mxu1 }
 0x290   : > { %v3194_v3 = vpop.f32.mrb[3].mxu1  ;;  %3567 = vmatmul.mubr.bf16.gmra.mrb[44].mxu1 %v4971_v15 }
 0x291   : > { %v5099_v7 = vadd.f32 %v3194_v3, %v3193_v6  ;;  %3583 = vmatpush3.bf16.msra.mxu1 %v3912_v22  ;;  %3586 = vmatprep.mubr.bf16.mxu1 %v4717_v13  ;;  %v3918_v6 = vld [vmem:[#allocation8 + $0x20] sm:$0xff]  }
 0x292   : > { %3584 = vmatprep.subr.bf16.mxu1 %v3913_v59  ;;  %3610 = vmatprep.subr.bf16.mxu0 %v3918_v6 }
 0x293   : > { %3611 = vmatpush3.bf16.msra.mxu0 %v3918_v6 }
 0x295   : > { %3585 = vmatpush3.bf16.msra.mxu1 %v3913_v59 }
 0x298   : > { %3587 = vmatmul.mubr.bf16.vlgmr.msra.gmra.mrb[32].mxu1 %v4767_v55 }
 0x299   : > { %3590 = vmatprep.mubr.bf16.mxu1 %v4819_v61 }
 0x29b   : > { %v3196_v9 = vpop.f32.mrb[4].mxu1  ;;  %v3350_v46 = vpop.f32.mrb[60].mxu0 }
 0x29c   : > { %v3197_v52 = vpop.f32.mrb[5].mxu1  ;;  %v3351_v1 = vpop.f32.mrb[61].mxu0 }
 0x29d   : > { %v5104_v10 = vadd.f32 %v3197_v52, %v3196_v9  ;;  %v5106_v12 = vadd.f32 %v3351_v1, %v3350_v46  ;;  %v3199_v16 = vpop.f32.mrb[6].mxu1  ;;  %v3353_v26 = vpop.f32.mrb[62].mxu0  ;;  %v3919_v1 = vld [vmem:[#allocation8 + $0x28] sm:$0xff]  }
 0x29e   : > { %v3200_v21 = vpop.f32.mrb[7].mxu1  ;;  %v3354_v5 = vpop.f32.mrb[63].mxu0  ;;  %3612 = vmatprep.subr.bf16.mxu0 %v3919_v1 }
 0x29f   : > { %v5108_v44 = vadd.f32 %v3200_v21, %v3199_v16  ;;  %v5110_v13 = vadd.f32 %v3354_v5, %v3353_v26  ;;  %v3920_v21 = vld [vmem:[#allocation8 + $0x30] sm:$0xff]   ;;  %3613 = vmatpush3.bf16.msra.mxu0 %v3919_v1 }
 0x2a0   : > { %3591 = vmatmul.mubr.bf16.gmra.mrb[36].mxu1 %v4869_v11  ;;  %3614 = vmatprep.subr.bf16.mxu0 %v3920_v21 }
 0x2a1   : > { %3594 = vmatprep.mubr.bf16.mxu1 %v4921_v34 }
 0x2a3   : > { %3615 = vmatpush3.bf16.msra.mxu0 %v3920_v21 }
 0x2a4   : > { %3616 = vmatprep.subr.bf16.mxu0 %v3921_v50 }
 0x2a5   : > { %v3202_v55 = vpop.f32.mrb[8].mxu1  ;;  %v3356_v61 = vpop.f32.mrb[64].mxu0 }
 0x2a6   : > { %v3203_v0 = vpop.f32.mrb[9].mxu1  ;;  %v3357_v51 = vpop.f32.mrb[65].mxu0 }
 0x2a7   : > { %v5114_v49 = vadd.f32 %v3203_v0, %v3202_v55  ;;  %v5116_v53 = vadd.f32 %v3357_v51, %v3356_v61  ;;  %v3205_v37 = vpop.f32.mrb[10].mxu1  ;;  %v3359_v40 = vpop.f32.mrb[66].mxu0  ;;  %3617 = vmatpush3.bf16.msra.mxu0 %v3921_v50 }
 0x2a8   : > { %v3206_v20 = vpop.f32.mrb[11].mxu1  ;;  %v3360_v18 = vpop.f32.mrb[67].mxu0  ;;  %3595 = vmatmul.mubr.bf16.gmra.mrb[40].mxu1 %v4971_v15 }
 0x2a9   : > { %v5119_v54 = vadd.f32 %v3206_v20, %v3205_v37  ;;  %v5121_v23 = vadd.f32 %v3360_v18, %v3359_v40  ;;  %3598 = vmatprep.mubr.bf16.mxu1 %v5020_v38 }
 0x2b0   : > { %3599 = vmatmul.mubr.bf16.gmra.mrb[44].mxu1 %v5038_v24 }
 0x2b3   : > { %v3208_v11 = vpop.f32.mrb[12].mxu1  ;;  %v3362_v34 = vpop.f32.mrb[68].mxu0 }
 0x2b4   : > { %v3209_v56 = vpop.f32.mrb[13].mxu1  ;;  %v3363_v27 = vpop.f32.mrb[69].mxu0 }
 0x2b5   : > { %v5125_v28 = vadd.f32 %v3209_v56, %v3208_v11  ;;  %v5127_v33 = vadd.f32 %v3363_v27, %v3362_v34  ;;  %v3211_v32 = vpop.f32.mrb[14].mxu1  ;;  %v3365_v63 = vpop.f32.mrb[70].mxu0 }
 0x2b6   : > { %v3212_v36 = vpop.f32.mrb[15].mxu1  ;;  %v3366_v15 = vpop.f32.mrb[71].mxu0 }
 0x2b7   : > { %v5129_v31 = vadd.f32 %v3212_v36, %v3211_v32  ;;  %v5131_v39 = vadd.f32 %v3366_v15, %v3365_v63 }
 0x2bd   : > { %v3214_v38 = vpop.f32.mrb[16].mxu1  ;;  %v3368_v24 = vpop.f32.mrb[72].mxu0 }
 0x2be   : > { %v3215_v58 = vpop.f32.mrb[17].mxu1  ;;  %v3369_v41 = vpop.f32.mrb[73].mxu0 }
 0x2bf   : > { %v5133_v43 = vadd.f32 %v3215_v58, %v3214_v38  ;;  %v5135_v60 = vadd.f32 %v3369_v41, %v3368_v24  ;;  %v3217_v48 = vpop.f32.mrb[18].mxu1  ;;  %v3371_v35 = vpop.f32.mrb[74].mxu0 }
 0x2c0   : > { %v3218_v47 = vpop.f32.mrb[19].mxu1  ;;  %v3372_v2 = vpop.f32.mrb[75].mxu0 }
 0x2c1   : > { %v5137_v8 = vadd.f32 %v3218_v47, %v3217_v48  ;;  %v5139_v14 = vadd.f32 %v3372_v2, %v3371_v35 }
 0x2cb   : > { %v3220_v25 = vpop.f32.mrb[20].mxu1  ;;  %v3374_v29 = vpop.f32.mrb[76].mxu0 }
 0x2cc   : > { %v3221_v17 = vpop.f32.mrb[21].mxu1  ;;  %v3375_v45 = vpop.f32.mrb[77].mxu0 }
 0x2cd   : > { %v5141_v22 = vadd.f32 %v3221_v17, %v3220_v25  ;;  %v5143_v19 = vadd.f32 %v3375_v45, %v3374_v29  ;;  %v3223_v4 = vpop.f32.mrb[22].mxu1  ;;  %v3377_v59 = vpop.f32.mrb[78].mxu0 }
 0x2ce   : > { %v3224_v3 = vpop.f32.mrb[23].mxu1  ;;  %v3378_v9 = vpop.f32.mrb[79].mxu0 }
 0x2cf   : > { %v5145_v46 = vadd.f32 %v3224_v3, %v3223_v4  ;;  %v5147_v52 = vadd.f32 %v3378_v9, %v3377_v59 }
 0x2d5   : > { %v3226_v16 = vpop.f32.mrb[24].mxu1  ;;  %v3380_v26 = vpop.f32.mrb[80].mxu0 }
 0x2d6   : > { %v3227_v5 = vpop.f32.mrb[25].mxu1  ;;  %v3381_v55 = vpop.f32.mrb[81].mxu0 }
 0x2d7   : > { %v5149_v61 = vadd.f32 %v3227_v5, %v3226_v16  ;;  %v5151_v0 = vadd.f32 %v3381_v55, %v3380_v26  ;;  %v3229_v51 = vpop.f32.mrb[26].mxu1  ;;  %v3383_v37 = vpop.f32.mrb[82].mxu0 }
 0x2d8   : > { %v3230_v40 = vpop.f32.mrb[27].mxu1  ;;  %v3384_v20 = vpop.f32.mrb[83].mxu0 }
 0x2d9   : > { %v5153_v18 = vadd.f32 %v3230_v40, %v3229_v51  ;;  %v5155_v11 = vadd.f32 %v3384_v20, %v3383_v37 }
 0x2e3   : > { %v3232_v34 = vpop.f32.mrb[28].mxu1  ;;  %v3386_v56 = vpop.f32.mrb[84].mxu0 }
 0x2e4   : > { %v3233_v27 = vpop.f32.mrb[29].mxu1  ;;  %v3387_v32 = vpop.f32.mrb[85].mxu0 }
 0x2e5   : > { %v5157_v63 = vadd.f32 %v3233_v27, %v3232_v34  ;;  %v5159_v36 = vadd.f32 %v3387_v32, %v3386_v56  ;;  %v3235_v15 = vpop.f32.mrb[30].mxu1  ;;  %v3389_v57 = vpop.f32.mrb[86].mxu0 }
 0x2e6   : > { %v3236_v38 = vpop.f32.mrb[31].mxu1  ;;  %v3390_v24 = vpop.f32.mrb[87].mxu0 }
 0x2e7   : > { %v5161_v58 = vadd.f32 %v3236_v38, %v3235_v15  ;;  %v5163_v41 = vadd.f32 %v3390_v24, %v3389_v57 }
 0x2ee   : > { %v3392_v48 = vpop.f32.mrb[88].mxu0 }
 0x2ef   : > { %v3393_v35 = vpop.f32.mrb[89].mxu0 }
 0x2f0   : > { %v5165_v47 = vadd.f32 %v3393_v35, %v3392_v48  ;;  %v3395_v2 = vpop.f32.mrb[90].mxu0 }
 0x2f1   : > { %v3396_v30 = vpop.f32.mrb[91].mxu0 }
 0x2f2   : > { %v5167_v42 = vadd.f32 %v3396_v30, %v3395_v2 }
 0x30b   : > { %v3270_v25 = vpop.f32.mrb[48].mxu1 }
 0x30c   : > { %v3271_v29 = vpop.f32.mrb[49].mxu1 }
 0x30d   : > { %v3272_v17 = vadd.f32 %v3271_v29, %v3270_v25  ;;  %v3273_v45 = vpop.f32.mrb[50].mxu1 }
 0x30e   : > { %v3274_v4 = vpop.f32.mrb[51].mxu1 }
 0x30f   : > { %v3637_v59 = vadd.f32 %v3272_v17, %v5096_v62  ;;  %v3275_v6 = vadd.f32 %v3274_v4, %v3273_v45 }
 0x311   : > { %v3643_v3 = vadd.f32 %v3275_v6, %v5099_v7  ;;  %v5172_v9 = vadd.f32 %v3637_v59, %v5106_v12 }
 0x313   : > { %v3276_v1 = vpop.f32.mrb[52].mxu1  ;;  %v5175_v16 = vadd.f32 %v3643_v3, %v5110_v13 }
 0x314   : > { %v3277_v26 = vpop.f32.mrb[53].mxu1 }
 0x315   : > { %v3278_v21 = vadd.f32 %v3277_v26, %v3276_v1  ;;  %v3279_v5 = vpop.f32.mrb[54].mxu1 }
 0x316   : > { %v3280_v55 = vpop.f32.mrb[55].mxu1 }
 0x317   : > { %v3634_v51 = vadd.f32 %v3278_v21, %v5104_v10  ;;  %v3281_v37 = vadd.f32 %v3280_v55, %v3279_v5 }
 0x319   : > { %v3640_v40 = vadd.f32 %v3281_v37, %v5108_v44  ;;  %v5180_v62 = vadd.f32 %v3634_v51, %v5116_v53 }
 0x31b   : > { %v3282_v7 = vpop.f32.mrb[56].mxu1  ;;  %v5183_v12 = vadd.f32 %v3640_v40, %v5121_v23 }
 0x31c   : > { %v3283_v20 = vpop.f32.mrb[57].mxu1 }
 0x31d   : > { %v3284_v34 = vadd.f32 %v3283_v20, %v3282_v7  ;;  %v3285_v13 = vpop.f32.mrb[58].mxu1 }
 0x31e   : > { %v3286_v56 = vpop.f32.mrb[59].mxu1 }
 0x31f   : > { %v3649_v27 = vadd.f32 %v3284_v34, %v5114_v49  ;;  %v3287_v32 = vadd.f32 %v3286_v56, %v3285_v13 }
 0x321   : > { %v3655_v15 = vadd.f32 %v3287_v32, %v5119_v54  ;;  %v5188_v10 = vadd.f32 %v3649_v27, %v5127_v33 }
 0x323   : > { %v3288_v44 = vpop.f32.mrb[60].mxu1  ;;  %v5191_v53 = vadd.f32 %v3655_v15, %v5131_v39 }
 0x324   : > { %v3289_v57 = vpop.f32.mrb[61].mxu1 }
 0x325   : > { %v3290_v38 = vadd.f32 %v3289_v57, %v3288_v44  ;;  %v3291_v23 = vpop.f32.mrb[62].mxu1 }
 0x326   : > { %v3292_v24 = vpop.f32.mrb[63].mxu1 }
 0x327   : > { %v3646_v48 = vadd.f32 %v3290_v38, %v5125_v28  ;;  %v3293_v35 = vadd.f32 %v3292_v24, %v3291_v23 }
 0x329   : > { %v3652_v2 = vadd.f32 %v3293_v35, %v5129_v31  ;;  %v5196_v49 = vadd.f32 %v3646_v48, %v5135_v60 }
 0x32b   : > { %v3294_v54 = vpop.f32.mrb[64].mxu1  ;;  %v5199_v33 = vadd.f32 %v3652_v2, %v5139_v14 }
 0x32c   : > { %v3295_v30 = vpop.f32.mrb[65].mxu1 }
 0x32d   : > { %v3296_v50 = vadd.f32 %v3295_v30, %v3294_v54  ;;  %v3297_v39 = vpop.f32.mrb[66].mxu1 }
 0x32e   : > { %v3298_v25 = vpop.f32.mrb[67].mxu1 }
 0x32f   : > { %v3661_v29 = vadd.f32 %v3296_v50, %v5133_v43  ;;  %v3299_v17 = vadd.f32 %v3298_v25, %v3297_v39 }
 0x331   : > { %v3667_v45 = vadd.f32 %v3299_v17, %v5137_v8  ;;  %v5204_v28 = vadd.f32 %v3661_v29, %v5143_v19 }
 0x333   : > { %v3300_v31 = vpop.f32.mrb[68].mxu1  ;;  %v5207_v60 = vadd.f32 %v3667_v45, %v5147_v52 }
 0x334   : > { %v3301_v4 = vpop.f32.mrb[69].mxu1 }
 0x335   : > { %v3302_v59 = vadd.f32 %v3301_v4, %v3300_v31  ;;  %v3303_v14 = vpop.f32.mrb[70].mxu1 }
 0x336   : > { %v3304_v6 = vpop.f32.mrb[71].mxu1 }
 0x337   : > { %v3658_v3 = vadd.f32 %v3302_v59, %v5141_v22  ;;  %v3305_v1 = vadd.f32 %v3304_v6, %v3303_v14 }
 0x339   : > { %v3664_v26 = vadd.f32 %v3305_v1, %v5145_v46  ;;  %v5212_v43 = vadd.f32 %v3658_v3, %v5151_v0 }
 0x33b   : > { %v3306_v8 = vpop.f32.mrb[72].mxu1  ;;  %v5215_v19 = vadd.f32 %v3664_v26, %v5155_v11 }
 0x33c   : > { %v3307_v21 = vpop.f32.mrb[73].mxu1 }
 0x33d   : > { %v3308_v5 = vadd.f32 %v3307_v21, %v3306_v8  ;;  %v3309_v52 = vpop.f32.mrb[74].mxu1 }
 0x33e   : > { %v3310_v55 = vpop.f32.mrb[75].mxu1 }
 0x33f   : > { %v3673_v51 = vadd.f32 %v3308_v5, %v5149_v61  ;;  %v3311_v37 = vadd.f32 %v3310_v55, %v3309_v52 }
 0x341   : > { %v3679_v40 = vadd.f32 %v3311_v37, %v5153_v18  ;;  %v5220_v22 = vadd.f32 %v3673_v51, %v5159_v36 }
 0x343   : > { %v3312_v46 = vpop.f32.mrb[76].mxu1  ;;  %v5223_v0 = vadd.f32 %v3679_v40, %v5163_v41  ;;  %v5236_v41 = vld [vmem:[%s5541_s22] ss:$0 sm:$0xff] }
 0x344   : > { %v3313_v7 = vpop.f32.mrb[77].mxu1 }
 0x345   : > { %v3314_v20 = vadd.f32 %v3313_v7, %v3312_v46  ;;  %v3315_v11 = vpop.f32.mrb[78].mxu1 }
 0x346   : > { %v3316_v34 = vpop.f32.mrb[79].mxu1 }
 0x347   : > { %v3670_v13 = vadd.f32 %v3314_v20, %v5157_v63  ;;  %v3317_v56 = vadd.f32 %v3316_v34, %v3315_v11  ;;  %v5242_v63 = vld [vmem:[%s5542_s12] ss:$0 sm:$0xff]  ;;  %s5354_s12 = scalar_lea.hbm %s5546_s10, %s3147_s16 }
 0x349   : > { %v3676_v27 = vadd.f32 %v3317_v56, %v5161_v58  ;;  %v5228_v61 = vadd.f32 %v3670_v13, %v5165_v47 }
 0x34b   : > { %v5231_v18 = vadd.f32 %v3676_v27, %v5167_v42 }
 0x36b   : > { %v3588_v36 = vpop.f32.mrb[32].mxu1 }
 0x36c   : > { %v3636_v32 = vadd.f32 %v5180_v62, %v3588_v36  ;;  %v2431_v15 = vpop.f32.mrb[33].mxu1 }
 0x36d   : > { %v3639_v58 = vadd.f32 %v5172_v9, %v2431_v15  ;;  %v3589_v47 = vpop.f32.mrb[34].mxu1 }
 0x36e   : > { %v2519_v42 = vmul.f32 %v3636_v32, %v5236_v41  ;;  %v3642_v44 = vadd.f32 %v5183_v12, %v3589_v47  ;;  %v2434_v57 = vpop.f32.mrb[35].mxu1 }
 0x36f   : > { %v2517_v38 = vmul.f32 %v3639_v58, %v5236_v41  ;;  %v3645_v23 = vadd.f32 %v5175_v16, %v2434_v57 }
 0x370   : > { %v2542_v62 = vadd.f32 %v5242_v63, %v2519_v42  ;;  %v2520_v24 = vmul.f32 %v3642_v44, %v5236_v41 }
 0x371   : > { %v2540_v48 = vadd.f32 %v5242_v63, %v2517_v38  ;;  %v2518_v35 = vmul.f32 %v3645_v23, %v5236_v41 }
 0x372   : > { %v2543_v9 = vadd.f32 %v5242_v63, %v2520_v24  ;;  %v2558_v30 = vmax.f32 %v2542_v62, 0.0 }
 0x373   : > { %v2541_v2 = vadd.f32 %v5242_v63, %v2518_v35  ;;  %v3592_v54 = vpop.f32.mrb[36].mxu1  ;;  %v2556_v25 = vmax.f32 %v2540_v48, 0.0 }
 0x374   : > { %v2559_v12 = vmax.f32 %v2543_v9, 0.0  ;;  %v3648_v50 = vadd.f32 %v5196_v49, %v3592_v54  ;;  %v2447_v39 = vpop.f32.mrb[37].mxu1 }
 0x375   : > { %v2557_v16 = vmax.f32 %v2541_v2, 0.0  ;;  %v3651_v29 = vadd.f32 %v5188_v10, %v2447_v39  ;;  %v3593_v17 = vpop.f32.mrb[38].mxu1 }
 0x376   : > { %v2573_v45 = vpack.c.bf16 %v2559_v12, %v2558_v30  ;;  %v2523_v31 = vmul.f32 %v3648_v50, %v5236_v41  ;;  %v3654_v4 = vadd.f32 %v5199_v33, %v3593_v17  ;;  %v2450_v59 = vpop.f32.mrb[39].mxu1 }
 0x377   : > { %v2521_v14 = vmul.f32 %v3651_v29, %v5236_v41  ;;  %v3657_v6 = vadd.f32 %v5191_v53, %v2450_v59  ;;  %v2572_v3 = vpack.c.bf16 %v2557_v16, %v2556_v25 }
 0x378   : > { %v2546_v1 = vadd.f32 %v5242_v63, %v2523_v31  ;;  %v2524_v49 = vmul.f32 %v3654_v4, %v5236_v41  ;;  %v5294_v31 = vld [vmem:[%s5543_s26] ss:$0 sm:$0xff]  ;;  %s4153_s26 = smov [#allocation10]  }
 0x379   : > { %v2544_v26 = vadd.f32 %v5242_v63, %v2521_v14  ;;  %v2522_v10 = vmul.f32 %v3657_v6, %v5236_v41  ;;  %3618 = vmatprep.mubr.bf16.mxu0 %v2572_v3  ;;  %v5300_v4 = vld [vmem:[%s5544_s25] ss:$0 sm:$0xff]  ;;  %s4040_s1 = sshll.u32 %s4153_s26, 4  ;;  %s4041_s1 = int_to_ptr.vmem [resolvable:$false] %s4040_s1 }
 0x37a   : > { %v2547_v8 = vadd.f32 %v5242_v63, %v2524_v49  ;;  %3619 = vmatmul.mubr.bf16.vlgmr.msra.gmra.mrb[92].mxu0 %v2573_v45  ;;  %v2562_v5 = vmax.f32 %v2546_v1, 0.0  ;;  %s4042_s4 = scalar_lea.vmem %s4041_s1, 4096  ;;  %p4043_p5 = scmp.lt.s32.totalorder %s5356_s17, %s4041_s1 }
 0x37b   : > { %v2545_v33 = vadd.f32 %v5242_v63, %v2522_v10  ;;  %v3596_v21 = vpop.f32.mrb[40].mxu1  ;;  %v2560_v51 = vmax.f32 %v2544_v26, 0.0  ;;  %p4044_p7 = scmp.lt.s32.totalorder %s4042_s4, %s4036_s11 }
 0x37c   : > { %v2563_v52 = vmax.f32 %v2547_v8, 0.0  ;;  %v3660_v53 = vadd.f32 %v5212_v43, %v3596_v21  ;;  %v2463_v55 = vpop.f32.mrb[41].mxu1 }
 0x37d   : > { %v2561_v37 = vmax.f32 %v2545_v33, 0.0  ;;  %v3663_v40 = vadd.f32 %v5204_v28, %v2463_v55  ;;  %v3597_v46 = vpop.f32.mrb[42].mxu1  ;;  %p4045_p11 = por %p4044_p7, %p4043_p5 }
 0x37e   : > { %v2527_v7 = vmul.f32 %v3660_v53, %v5236_v41  ;;  %v3666_v20 = vadd.f32 %v5215_v19, %v3597_v46  ;;  %v2466_v11 = vpop.f32.mrb[43].mxu1  ;;  %v2575_v34 = vpack.c.bf16 %v2563_v52, %v2562_v5 }
 0x37f   : > { %v2525_v13 = vmul.f32 %v3663_v40, %v5236_v41  ;;  %v3669_v56 = vadd.f32 %v5207_v60, %v2466_v11  ;;  %v2574_v27 = vpack.c.bf16 %v2561_v37, %v2560_v51  ;;  %p4046_p1 = pnand %p4045_p11, %p4039_p10 }
 0x380   : > { %v2550_v36 = vadd.f32 %v5242_v63, %v2527_v7  ;;  %v2528_v43 = vmul.f32 %v3666_v20, %v5236_v41 }
 0x381   : > { %v2548_v32 = vadd.f32 %v5242_v63, %v2525_v13  ;;  %v2526_v28 = vmul.f32 %v3669_v56, %v5236_v41  ;;  %3622 = vmatprep.mubr.bf16.mxu0 %v2574_v27 }
 0x382   : > { %v2551_v15 = vadd.f32 %v5242_v63, %v2528_v43  ;;  %3623 = vmatmul.mubr.bf16.gmra.mrb[96].mxu0 %v2575_v34  ;;  %v2566_v47 = vmax.f32 %v2550_v36, 0.0 }
 0x383   : > { %v2549_v19 = vadd.f32 %v5242_v63, %v2526_v28  ;;  %v3600_v58 = vpop.f32.mrb[44].mxu1  ;;  %v2564_v57 = vmax.f32 %v2548_v32, 0.0 }
 0x384   : > { %v2567_v42 = vmax.f32 %v2551_v15, 0.0  ;;  %v3672_v60 = vadd.f32 %v5228_v61, %v3600_v58  ;;  %v2479_v44 = vpop.f32.mrb[45].mxu1 }
 0x385   : > { %v2565_v38 = vmax.f32 %v2549_v19, 0.0  ;;  %v3675_v23 = vadd.f32 %v5220_v22, %v2479_v44  ;;  %v3601_v62 = vpop.f32.mrb[46].mxu1 }
 0x386   : > { %v2531_v24 = vmul.f32 %v3672_v60, %v5236_v41  ;;  %v3678_v48 = vadd.f32 %v5231_v18, %v3601_v62  ;;  %v2482_v35 = vpop.f32.mrb[47].mxu1  ;;  %v2577_v9 = vpack.c.bf16 %v2567_v42, %v2566_v47 }
 0x387   : > { %v2529_v2 = vmul.f32 %v3675_v23, %v5236_v41  ;;  %v3681_v54 = vadd.f32 %v5223_v0, %v2482_v35  ;;  %v2576_v30 = vpack.c.bf16 %v2565_v38, %v2564_v57 }
 0x388   : > { %v2554_v12 = vadd.f32 %v5242_v63, %v2531_v24  ;;  %v2532_v61 = vmul.f32 %v3678_v48, %v5236_v41 }
 0x389   : > { %v2552_v50 = vadd.f32 %v5242_v63, %v2529_v2  ;;  %v2530_v22 = vmul.f32 %v3681_v54, %v5236_v41  ;;  %3626 = vmatprep.mubr.bf16.mxu0 %v2576_v30 }
 0x38a   : > { %v2555_v39 = vadd.f32 %v5242_v63, %v2532_v61  ;;  %3627 = vmatmul.mubr.bf16.gmra.mrb[100].mxu0 %v2577_v9  ;;  %v2570_v25 = vmax.f32 %v2554_v12, 0.0 }
 0x38b   : > { %v2553_v18 = vadd.f32 %v5242_v63, %v2530_v22  ;;  %v2568_v29 = vmax.f32 %v2552_v50, 0.0 }
 0x38c   : > { %v2571_v16 = vmax.f32 %v2555_v39, 0.0 }
 0x38d   : > { %v2569_v0 = vmax.f32 %v2553_v18, 0.0 }
 0x38e   : > { %v2579_v17 = vpack.c.bf16 %v2571_v16, %v2570_v25 }
 0x38f   : > { %v2578_v45 = vpack.c.bf16 %v2569_v0, %v2568_v29 }
 0x391   : > { %3630 = vmatprep.mubr.bf16.mxu0 %v2578_v45 }
 0x392   : > { %3631 = vmatmul.mubr.bf16.gmra.mrb[104].mxu0 %v2579_v17 }
 0x44d   : > { %v3620_v41 = vpop.f32.mrb[92].mxu0 }
 0x44e   : > { %v2750_v63 = vmul.f32 %v3620_v41, %v5294_v31  ;;  %v2678_v59 = vpop.f32.mrb[93].mxu0 }
 0x44f   : > { %v2748_v14 = vmul.f32 %v5294_v31, %v2678_v59  ;;  %v3621_v6 = vpop.f32.mrb[94].mxu0 }
 0x450   : > { %v2773_v3 = vadd.f32 %v5300_v4, %v2750_v63  ;;  %v2751_v1 = vmul.f32 %v3621_v6, %v5294_v31  ;;  %v2681_v49 = vpop.f32.mrb[95].mxu0 }
 0x451   : > { %v2771_v26 = vadd.f32 %v5300_v4, %v2748_v14  ;;  %v2749_v10 = vmul.f32 %v5294_v31, %v2681_v49 }
 0x452   : > { %2789 = vst [vmem:[%s5308_s27 + $0x10] sm:$0xff] %v2773_v3  ;;  %v2774_v8 = vadd.f32 %v5300_v4, %v2751_v1 }
 0x453   : > { %2787 = vst [vmem:[%s5308_s27] sm:$0xff] %v2771_v26  ;;  %v2772_v33 = vadd.f32 %v5300_v4, %v2749_v10 }
 0x454   : > { %2790 = vst [vmem:[%s5308_s27 + $0x18] sm:$0xff] %v2774_v8 }
 0x455   : > { %2788 = vst [vmem:[%s5308_s27 + $0x8] sm:$0xff] %v2772_v33  ;;  %v3624_v21 = vpop.f32.mrb[96].mxu0 }
 0x456   : > { %v2754_v5 = vmul.f32 %v3624_v21, %v5294_v31  ;;  %v2694_v52 = vpop.f32.mrb[97].mxu0 }
 0x457   : > { %v2752_v53 = vmul.f32 %v5294_v31, %v2694_v52  ;;  %v3625_v55 = vpop.f32.mrb[98].mxu0 }
 0x458   : > { %v2777_v51 = vadd.f32 %v5300_v4, %v2754_v5  ;;  %v2755_v37 = vmul.f32 %v3625_v55, %v5294_v31  ;;  %v2697_v40 = vpop.f32.mrb[99].mxu0 }
 0x459   : > { %v2775_v46 = vadd.f32 %v5300_v4, %v2752_v53  ;;  %v2753_v7 = vmul.f32 %v5294_v31, %v2697_v40 }
 0x45a   : > { %2793 = vst [vmem:[%s5308_s27 + $0x30] sm:$0xff] %v2777_v51  ;;  %v2778_v20 = vadd.f32 %v5300_v4, %v2755_v37 }
 0x45b   : > { %2791 = vst [vmem:[%s5308_s27 + $0x20] sm:$0xff] %v2775_v46  ;;  %v2776_v11 = vadd.f32 %v5300_v4, %v2753_v7 }
 0x45c   : > { %2794 = vst [vmem:[%s5308_s27 + $0x38] sm:$0xff] %v2778_v20 }
 0x45d   : > { %2792 = vst [vmem:[%s5308_s27 + $0x28] sm:$0xff] %v2776_v11  ;;  %v3628_v34 = vpop.f32.mrb[100].mxu0 }
 0x45e   : > { %v2758_v13 = vmul.f32 %v3628_v34, %v5294_v31  ;;  %v2710_v56 = vpop.f32.mrb[101].mxu0 }
 0x45f   : > { %v2756_v27 = vmul.f32 %v5294_v31, %v2710_v56  ;;  %v3629_v36 = vpop.f32.mrb[102].mxu0 }
 0x460   : > { %v2781_v43 = vadd.f32 %v5300_v4, %v2758_v13  ;;  %v2759_v32 = vmul.f32 %v3629_v36, %v5294_v31  ;;  %v2713_v28 = vpop.f32.mrb[103].mxu0 }
 0x461   : > { %v2779_v15 = vadd.f32 %v5300_v4, %v2756_v27  ;;  %v2757_v19 = vmul.f32 %v5294_v31, %v2713_v28 }
 0x462   : > { %2797 = vst [vmem:[%s5308_s27 + $0x50] sm:$0xff] %v2781_v43  ;;  %v2782_v58 = vadd.f32 %v5300_v4, %v2759_v32 }
 0x463   : > { %2795 = vst [vmem:[%s5308_s27 + $0x40] sm:$0xff] %v2779_v15  ;;  %v2780_v47 = vadd.f32 %v5300_v4, %v2757_v19 }
 0x464   : > { %2798 = vst [vmem:[%s5308_s27 + $0x58] sm:$0xff] %v2782_v58 }
 0x465   : > { %2796 = vst [vmem:[%s5308_s27 + $0x48] sm:$0xff] %v2780_v47  ;;  %v3632_v42 = vpop.f32.mrb[104].mxu0 }
 0x466   : > { %v2762_v60 = vmul.f32 %v3632_v42, %v5294_v31  ;;  %v2726_v44 = vpop.f32.mrb[105].mxu0 }
 0x467   : > { %v2760_v57 = vmul.f32 %v5294_v31, %v2726_v44  ;;  %v3633_v38 = vpop.f32.mrb[106].mxu0 }
 0x468   : > { %v2785_v23 = vadd.f32 %v5300_v4, %v2762_v60  ;;  %v2763_v62 = vmul.f32 %v3633_v38, %v5294_v31  ;;  %v2729_v24 = vpop.f32.mrb[107].mxu0 }
 0x469   : > { %v2783_v48 = vadd.f32 %v5300_v4, %v2760_v57  ;;  %v2761_v35 = vmul.f32 %v5294_v31, %v2729_v24 }
 0x46a   : > { %2801 = vst [vmem:[%s5308_s27 + $0x70] sm:$0xff] %v2785_v23  ;;  %v2786_v9 = vadd.f32 %v5300_v4, %v2763_v62 }
 0x46b   : > { %2799 = vst [vmem:[%s5308_s27 + $0x60] sm:$0xff] %v2783_v48  ;;  %v2784_v2 = vadd.f32 %v5300_v4, %v2761_v35 }
 0x46c   : > { %2802 = vst [vmem:[%s5308_s27 + $0x78] sm:$0xff] %v2786_v9 }
 0x46d   : > { %2800 = vst [vmem:[%s5308_s27 + $0x68] sm:$0xff] %v2784_v2 }
 0x46e   : > { %4049 = shalt.err (!%p4046_p1)
}
 0x46f   : > { %s4050_s23 = scalar_lea.hbm %s5354_s12, 2048  ;;  %s4054_s13 = scalar_lea.hbm %s5546_s10, 8192 }
 0x470   : > { %p4051_p2 = scmp.ne.s32.totalorder %s5354_s12, %s4050_s23  ;;  %p4055_p13 = scmp.lt.u32.totalorder %s5354_s12, %s5546_s10 }
 0x471   : > { %p4056_p4 = scmp.lt.u32.totalorder %s4054_s13, %s4050_s23  ;;  %p4058_p6 = scmp.lt.u32.totalorder %s4050_s23, %s5354_s12 }
 0x472   : > { %p4052_p8 = pnand %p4051_p2, %p4386_p3 }
 0x473   : > { %p4057_p9 = por %p4056_p4, %p4055_p13 }
 0x474   : > { %p4053_p12 = pneg %p4052_p8 }
 0x475   : > { %p4059_p0 = por %p4058_p6, %p4057_p9 }
 0x477   : > { %p4060_p10 = pnand %p4059_p0, %p4053_p12 }
 0x479   : > { %4063 = shalt.err (!%p4060_p10)
}
 0x47a   : > { %s4154_s28 = smov 128   ;;  %s4155_s16 = smov 8  }
 0x47b   : > { %3732 = dma.vmem_to_hbm [thread:$0]  (%p4386_p3), %s5356_s17, 2048, %s5354_s12, %s2804_s3, %s4154_s28, %s4154_s28, %s4155_s16  }
 0x47c PF: > { %s5547_s22 = sld [smem:[#allocation15_spill]]  ;;  %s5548_s21 = sld [smem:[#allocation17_spill]] }
 0x47d   : > { %p3759_p5 = scmp.ge.s32.totalorder %s4142_s20, 2 }
 0x482   : > { %s2835_s11 = sand.u32 1, %s5547_s22   ;;  %p5549_p7 = scmp.ne.s32.totalorder %s5548_s21, 0 }
 0x483   : > { %s2836_s26 = scalar_lea.sflag [#allocation4], %s2835_s11 }
 0x484   : > { %p3749_p11 = pnand %p3759_p5, %p5549_p7 }
 0x486   : > { %4109 = dma.done.wait (!%p3749_p11), %s2836_s26, 2048  }
 0x487   : > { %4111 = vsyncadd (!%p3749_p11), %s2836_s26, 4294965248  ;;  %s28_s20 = sadd.s32 1, %s4142_s20   ;;  %s5550_s13 = smov %s4118_s14 }
 0x488   : > { %p25_p1 = scmp.ge.s32.totalorder %s28_s20, 6   ;;  %s5551_s14 = smov %s4122_s15 }
 0x489   : > { %s5552_s15 = smov %s4403_s24  ;;  %s5553_s16 = smov %s4134_s18 }
 0x48a   : > { %s5554_s17 = smov %s4138_s19  ;;  %s5555_s18 = smov %s5558_s9 }
 0x48b   : > { %s5556_s19 = smov %s5562_s30  ;;  %27 = sbr.rel (!%p25_p1) target bundleno = 18 (0x12), region = 119 }
 0x492   :  { %2841 = vsyncpa [#allocation3], 1 }
 0x493   :  { %2843 = vsyncpa [#allocation3 + $0x1], 1 }
 0x494   :  { %2844 = vsyncpa [#allocation6], 1 }
 0x495   :  { %2845 = vsyncpa [#allocation9], 1 }
 0x496   :  { %2846 = vsyncpa [#allocation4], 1 }
 0x497   :  { %2848 = vsyncpa [#allocation4 + $0x1], 1 }

</bundles_post_ra>
